<compile_context>
chip_gen: v7x
topology: tpu7x:2x2x1
jax: 0.10.0
libtpu: 0.0.40
codegen_flags: <defaults>
</compile_context>

<pallas_src>
import jax
import jax.numpy as jnp
from jax.experimental import pallas as pl
from jax.experimental.pallas import tpu as pltpu

C_OUT = 32          # conv output channels
N_HID = 100
N_HID_PAD = 128     # padded hidden width (zero pads, ReLU keeps them 0)
N_CLS = 10
N_CLS_PAD = 128     # lane-dense output width (pad logits forced to -1e30)
TB_MAX = 512        # batch tile (samples per grid step)


def _round_up(v, m):
    return (v + m - 1) // m * m


def mnist_kernel(p_ref, wc_ref, bc_ref, w1_ref, b1_ref, w2_ref, b2_ref,
                 out_ref):
    # p_ref : (32, TB, 72) bf16   [quad*8 + band, sample, tap*8 + pooled col]
    # wc_ref: (72, 256)    bf16   conv weight, block-diag over pooled col
    # bc_ref: (1, 256)     f32    conv bias broadcast over pooled col
    # w1_ref: (8, 256, 128) bf16  per-band slice of Linear(2048,100) (padded)
    # b1_ref: (1, 128)     f32
    # w2_ref: (128, 128)   bf16   cols >= 10 are zero
    # b2_ref: (1, 128)     f32    cols >= 10 are -1e30 (masked in softmax)
    tb = p_ref.shape[1]
    wc = wc_ref[...]
    # Hoisted: JAX does not CSE broadcast_in_dim inside the (unrolled) loop.
    bcb = jnp.broadcast_to(bc_ref[...], (tb, 256))

    def band(i, acc):
        # MaxPool2d(2) as a running max over the 4 quadrant conv matmuls:
        # at most 2 (TB,256) f32 tiles live at a time.
        c = jnp.dot(p_ref[i], wc, preferred_element_type=jnp.float32)
        c = jnp.maximum(c, jnp.dot(p_ref[8 + i], wc,
                                   preferred_element_type=jnp.float32))
        c = jnp.maximum(c, jnp.dot(p_ref[16 + i], wc,
                                   preferred_element_type=jnp.float32))
        c = jnp.maximum(c, jnp.dot(p_ref[24 + i], wc,
                                   preferred_element_type=jnp.float32))
        act = jnp.maximum(c + bcb, 0.0).astype(wc.dtype)       # (TB,256) bf16
        # this band's slice of Linear(2048,100): (TB,256)@(256,128)
        return acc + jnp.dot(act, w1_ref[i],
                             preferred_element_type=jnp.float32)

    acc0 = jnp.zeros((tb, N_HID_PAD), jnp.float32)
    acc = jax.lax.fori_loop(0, 8, band, acc0, unroll=True)

    h = jnp.maximum(acc + b1_ref[...], 0.0).astype(wc.dtype)   # (TB, 128)

    # Linear(100 -> 10) + Softmax(dim=1), lane-dense (TB,128) output.
    logits = jnp.dot(h, w2_ref[...],
                     preferred_element_type=jnp.float32) + b2_ref[...]
    m = jnp.max(logits, axis=-1, keepdims=True)
    e = jnp.exp(logits - m)                                     # pad cols ~ 0
    inv = pl.reciprocal(jnp.sum(e, axis=-1, keepdims=True), approx=True)
    out_ref[...] = e * inv


def mnist_classifier(x, params):
    conv_w, conv_b, lin1_w, lin1_b, lin2_w, lin2_b = params
    n = x.shape[0]
    assert x.shape[1:] == (1, 30, 30), "Linear(2048,100) implies 30x30 input"

    # ---- batch tiling ----
    n8 = _round_up(n, 8)
    tb = min(TB_MAX, n8)
    # v7x has 2 TensorCores: when one step would hold the whole (large) batch,
    # split it so grid >= 2 and "parallel" can shard across cores.
    if n8 // tb < 2 and n8 >= 512:
        tb = _round_up((n8 + 1) // 2, 8)
    n_pad = _round_up(n8, tb)
    grid = n_pad // tb

    # ---- im2col glue (conv padding=2), packed per (quadrant, pooled row) ---
    # Cast to bf16 BEFORE slab construction: halves host-side HBM traffic.
    xb = jnp.pad(x[:, 0], ((0, n_pad - n), (2, 2), (2, 2)))
    xb = xb.astype(jnp.bfloat16)                                # (Np, 34, 34)
    slabs = []
    for a in (0, 1):                   # maxpool quadrant row offset
        for b in (0, 1):               # maxpool quadrant col offset
            taps = []
            for ki in range(3):
                for kj in range(3):
                    r0 = 2 * a + ki
                    c0 = 2 * b + kj
                    # [n, i, j] = xp[n, 4i + 2a + ki, 4j + 2b + kj]
                    taps.append(xb[:, r0:r0 + 29:4, c0:c0 + 29:4])  # (Np,8,8)
            t = jnp.stack(taps, axis=2)            # (Np, 8, 9, 8) [n,i,k,j]
            t = jnp.transpose(t, (1, 0, 2, 3))     # (8, Np, 9, 8) [i,n,k,j]
            slabs.append(t.reshape(8, n_pad, 72))
    patches = jnp.concatenate(slabs, axis=0)       # (32, Np, 72) bf16

    # ---- weight packing ----
    wk = conv_w.reshape(C_OUT, 9)                                  # [c, k]
    eye8 = jnp.eye(8, dtype=jnp.float32)
    # Wc8[k*8 + j, c*8 + j'] = wk[c, k] * (j == j')
    wc8 = jnp.einsum('ck,jm->kjcm', wk, eye8).reshape(72, 256)
    wc8 = wc8.astype(jnp.bfloat16)
    bc_vec = jnp.repeat(conv_b, 8).reshape(1, 256).astype(jnp.float32)

    # Linear1: torch flatten index is c*64 + i*8 + j  ->  per-band slices
    w1 = lin1_w.reshape(N_HID, C_OUT, 8, 8).transpose(2, 1, 3, 0)  # (8,32,8,100)
    w1 = w1.reshape(8, 256, N_HID)
    w1 = jnp.pad(w1, ((0, 0), (0, 0), (0, N_HID_PAD - N_HID)))
    w1 = w1.astype(jnp.bfloat16)                                   # (8,256,128)
    b1 = jnp.pad(lin1_b, (0, N_HID_PAD - N_HID)).reshape(1, N_HID_PAD)
    b1 = b1.astype(jnp.float32)

    # Linear2 padded to lane-dense 128 output cols; pad logits get -1e30 bias
    # so they vanish in the softmax (exp ~ 0) and the store is unmasked.
    w2 = jnp.pad(lin2_w.T, ((0, N_HID_PAD - N_HID), (0, N_CLS_PAD - N_CLS)))
    w2 = w2.astype(jnp.bfloat16)                                   # (128,128)
    b2 = jnp.full((1, N_CLS_PAD), -1e30, jnp.float32)
    b2 = b2.at[0, :N_CLS].set(lin2_b.astype(jnp.float32))

    def fixed(shape):
        return pl.BlockSpec(shape, lambda g: (0,) * len(shape))

    out = pl.pallas_call(
        mnist_kernel,
        out_shape=jax.ShapeDtypeStruct((n_pad, N_CLS_PAD), jnp.float32),
        grid_spec=pltpu.PrefetchScalarGridSpec(
            num_scalar_prefetch=0,
            grid=(grid,),
            in_specs=[
                pl.BlockSpec((32, tb, 72), lambda g: (0, g, 0)),
                fixed((72, 256)),
                fixed((1, 256)),
                fixed((8, 256, N_HID_PAD)),
                fixed((1, N_HID_PAD)),
                fixed((N_HID_PAD, N_CLS_PAD)),
                fixed((1, N_CLS_PAD)),
            ],
            out_specs=pl.BlockSpec((tb, N_CLS_PAD), lambda g: (g, 0)),
        ),
        compiler_params=pltpu.CompilerParams(
            dimension_semantics=("parallel",),
            vmem_limit_bytes=48 * 1024 * 1024),
        cost_estimate=pl.CostEstimate(
            flops=int(1_750_000) * n_pad,
            transcendentals=128 * n_pad,
            bytes_accessed=5_200 * n_pad),
    )(patches, wc8, bc_vec, w1, b1, w2, b2)
    return out[:n, :N_CLS]


def init_params(key):
    ks = jax.random.split(key, 6)
    s = 0.05
    conv_w = s * jax.random.normal(ks[0], (32, 1, 3, 3), jnp.float32)
    conv_b = s * jax.random.normal(ks[1], (32,), jnp.float32)
    lin1_w = s * jax.random.normal(ks[2], (100, 2048), jnp.float32)
    lin1_b = s * jax.random.normal(ks[3], (100,), jnp.float32)
    lin2_w = s * jax.random.normal(ks[4], (10, 100), jnp.float32)
    lin2_b = s * jax.random.normal(ks[5], (10,), jnp.float32)
    return conv_w, conv_b, lin1_w, lin1_b, lin2_w, lin2_b


def reference(x, params):
    """Plain-JAX (f32) replica of the PyTorch forward, for a sanity check."""
    conv_w, conv_b, lin1_w, lin1_b, lin2_w, lin2_b = params
    y = jax.lax.conv_general_dilated(
        x, conv_w, window_strides=(2, 2), padding=((2, 2), (2, 2)),
        dimension_numbers=("NCHW", "OIHW", "NCHW"))
    y = y + conv_b[None, :, None, None]
    y = jax.lax.reduce_window(y, -jnp.inf, jax.lax.max,
                              (1, 1, 2, 2), (1, 1, 2, 2), "VALID")
    y = y.reshape(x.shape[0], -1)
    y = jnp.maximum(y, 0.0)
    y = y @ lin1_w.T + lin1_b
    y = jnp.maximum(y, 0.0)
    y = y @ lin2_w.T + lin2_b
    return jax.nn.softmax(y, axis=1)


if __name__ == "__main__":
    key = jax.random.PRNGKey(0)
    pkey, xkey = jax.random.split(key)
    params = init_params(pkey)
    x = jax.random.normal(xkey, (2, 1, 30, 30), jnp.float32)

    out = jax.block_until_ready(mnist_classifier(x, params))
    ref = jax.block_until_ready(reference(x, params))

    assert out.shape == (2, 10)
    assert float(jnp.max(jnp.abs(jnp.sum(out, axis=1) - 1.0))) < 1e-2
    assert float(jnp.max(jnp.abs(out - ref))) < 2e-2
    print("KERNEL_OK")
</pallas_src>

<mosaic_0001>
module attributes {stable_mosaic.version = 11 : i64} {
  func.func @mnist_kernel(%arg0: i32, %arg1: memref<32x8x72xbf16, #tpu.memory_space<vmem>>, %arg2: memref<72x256xbf16, #tpu.memory_space<vmem>>, %arg3: memref<1x256xf32, #tpu.memory_space<vmem>>, %arg4: memref<8x256x128xbf16, #tpu.memory_space<vmem>>, %arg5: memref<1x128xf32, #tpu.memory_space<vmem>>, %arg6: memref<128x128xbf16, #tpu.memory_space<vmem>>, %arg7: memref<1x128xf32, #tpu.memory_space<vmem>>, %arg8: memref<8x128xf32, #tpu.memory_space<vmem>>) attributes {dimension_semantics = [#tpu.dimension_semantics<parallel>], iteration_bounds = array<i64: 1>, scalar_prefetch = 0 : i64, scratch_operands = 0 : i64, tpu.core_type = #tpu.core_type<tc>, window_params = [{transform_indices = @transform_0, window_bounds = array<i64: 32, 8, 72>}, {pipeline_mode = #tpu.pipeline_mode<synchronous>, transform_indices = @transform_1, window_bounds = array<i64: 72, 256>}, {pipeline_mode = #tpu.pipeline_mode<synchronous>, transform_indices = @transform_2, window_bounds = array<i64: 1, 256>}, {pipeline_mode = #tpu.pipeline_mode<synchronous>, transform_indices = @transform_3, window_bounds = array<i64: 8, 256, 128>}, {pipeline_mode = #tpu.pipeline_mode<synchronous>, transform_indices = @transform_4, window_bounds = array<i64: 1, 128>}, {pipeline_mode = #tpu.pipeline_mode<synchronous>, transform_indices = @transform_5, window_bounds = array<i64: 128, 128>}, {pipeline_mode = #tpu.pipeline_mode<synchronous>, transform_indices = @transform_6, window_bounds = array<i64: 1, 128>}, {transform_indices = @transform_7, window_bounds = array<i64: 8, 128>}]} {
    %c0 = arith.constant 0 : index
    %c0_0 = arith.constant 0 : index
    %0 = vector.load %arg2[%c0, %c0_0] : memref<72x256xbf16, #tpu.memory_space<vmem>>, vector<72x256xbf16>
    %c0_1 = arith.constant 0 : index
    %c0_2 = arith.constant 0 : index
    %1 = vector.load %arg3[%c0_1, %c0_2] : memref<1x256xf32, #tpu.memory_space<vmem>>, vector<1x256xf32>
    %2 = vector.shape_cast %1 : vector<1x256xf32> to vector<1x256xf32>
    %3 = vector.broadcast %2 : vector<1x256xf32> to vector<8x256xf32>
    %cst = arith.constant 0.000000e+00 : f32
    %4 = vector.broadcast %cst : f32 to vector<8x128xf32>
    %c0_i32 = arith.constant 0 : i32
    %5 = arith.index_cast %c0_i32 : i32 to index
    %c0_3 = arith.constant 0 : index
    %c0_4 = arith.constant 0 : index
    %6 = vector.load %arg1[%5, %c0_3, %c0_4] : memref<32x8x72xbf16, #tpu.memory_space<vmem>>, vector<1x8x72xbf16>
    %7 = vector.shape_cast %6 : vector<1x8x72xbf16> to vector<8x72xbf16>
    %cst_5 = arith.constant dense<0.000000e+00> : vector<8x256xf32>
    %8 = tpu.matmul %7, %0, %cst_5 {dimension_numbers = #tpu.dot_dimension_numbers<[1], [0], [0], [1], [0, 0, 1, 1], [], []>} : vector<8x72xbf16>, vector<72x256xbf16>, vector<8x256xf32> -> vector<8x256xf32>
    %c8_i32 = arith.constant 8 : i32
    %9 = arith.addi %c8_i32, %c0_i32 : i32
    %10 = arith.index_cast %9 : i32 to index
    %c0_6 = arith.constant 0 : index
    %c0_7 = arith.constant 0 : index
    %11 = vector.load %arg1[%10, %c0_6, %c0_7] : memref<32x8x72xbf16, #tpu.memory_space<vmem>>, vector<1x8x72xbf16>
    %12 = vector.shape_cast %11 : vector<1x8x72xbf16> to vector<8x72xbf16>
    %cst_8 = arith.constant dense<0.000000e+00> : vector<8x256xf32>
    %13 = tpu.matmul %12, %0, %cst_8 {dimension_numbers = #tpu.dot_dimension_numbers<[1], [0], [0], [1], [0, 0, 1, 1], [], []>} : vector<8x72xbf16>, vector<72x256xbf16>, vector<8x256xf32> -> vector<8x256xf32>
    %14 = arith.maximumf %8, %13 : vector<8x256xf32>
    %c16_i32 = arith.constant 16 : i32
    %15 = arith.addi %c16_i32, %c0_i32 : i32
    %16 = arith.index_cast %15 : i32 to index
    %c0_9 = arith.constant 0 : index
    %c0_10 = arith.constant 0 : index
    %17 = vector.load %arg1[%16, %c0_9, %c0_10] : memref<32x8x72xbf16, #tpu.memory_space<vmem>>, vector<1x8x72xbf16>
    %18 = vector.shape_cast %17 : vector<1x8x72xbf16> to vector<8x72xbf16>
    %cst_11 = arith.constant dense<0.000000e+00> : vector<8x256xf32>
    %19 = tpu.matmul %18, %0, %cst_11 {dimension_numbers = #tpu.dot_dimension_numbers<[1], [0], [0], [1], [0, 0, 1, 1], [], []>} : vector<8x72xbf16>, vector<72x256xbf16>, vector<8x256xf32> -> vector<8x256xf32>
    %20 = arith.maximumf %14, %19 : vector<8x256xf32>
    %c24_i32 = arith.constant 24 : i32
    %21 = arith.addi %c24_i32, %c0_i32 : i32
    %22 = arith.index_cast %21 : i32 to index
    %c0_12 = arith.constant 0 : index
    %c0_13 = arith.constant 0 : index
    %23 = vector.load %arg1[%22, %c0_12, %c0_13] : memref<32x8x72xbf16, #tpu.memory_space<vmem>>, vector<1x8x72xbf16>
    %24 = vector.shape_cast %23 : vector<1x8x72xbf16> to vector<8x72xbf16>
    %cst_14 = arith.constant dense<0.000000e+00> : vector<8x256xf32>
    %25 = tpu.matmul %24, %0, %cst_14 {dimension_numbers = #tpu.dot_dimension_numbers<[1], [0], [0], [1], [0, 0, 1, 1], [], []>} : vector<8x72xbf16>, vector<72x256xbf16>, vector<8x256xf32> -> vector<8x256xf32>
    %26 = arith.maximumf %20, %25 : vector<8x256xf32>
    %27 = arith.addf %26, %3 : vector<8x256xf32>
    %cst_15 = arith.constant 0.000000e+00 : f32
    %28 = vector.broadcast %cst_15 : f32 to vector<8x256xf32>
    %29 = arith.maximumf %27, %28 : vector<8x256xf32>
    %30 = arith.truncf %29 : vector<8x256xf32> to vector<8x256xbf16>
    %31 = arith.index_cast %c0_i32 : i32 to index
    %c0_16 = arith.constant 0 : index
    %c0_17 = arith.constant 0 : index
    %32 = vector.load %arg4[%31, %c0_16, %c0_17] : memref<8x256x128xbf16, #tpu.memory_space<vmem>>, vector<1x256x128xbf16>
    %33 = vector.shape_cast %32 : vector<1x256x128xbf16> to vector<256x128xbf16>
    %cst_18 = arith.constant dense<0.000000e+00> : vector<8x128xf32>
    %34 = tpu.matmul %30, %33, %cst_18 {dimension_numbers = #tpu.dot_dimension_numbers<[1], [0], [0], [1], [0, 0, 1, 1], [], []>} : vector<8x256xbf16>, vector<256x128xbf16>, vector<8x128xf32> -> vector<8x128xf32>
    %35 = arith.addf %4, %34 : vector<8x128xf32>
    %c1_i32 = arith.constant 1 : i32
    %36 = arith.index_cast %c1_i32 : i32 to index
    %c0_19 = arith.constant 0 : index
    %c0_20 = arith.constant 0 : index
    %37 = vector.load %arg1[%36, %c0_19, %c0_20] : memref<32x8x72xbf16, #tpu.memory_space<vmem>>, vector<1x8x72xbf16>
    %38 = vector.shape_cast %37 : vector<1x8x72xbf16> to vector<8x72xbf16>
    %cst_21 = arith.constant dense<0.000000e+00> : vector<8x256xf32>
    %39 = tpu.matmul %38, %0, %cst_21 {dimension_numbers = #tpu.dot_dimension_numbers<[1], [0], [0], [1], [0, 0, 1, 1], [], []>} : vector<8x72xbf16>, vector<72x256xbf16>, vector<8x256xf32> -> vector<8x256xf32>
    %c8_i32_22 = arith.constant 8 : i32
    %40 = arith.addi %c8_i32_22, %c1_i32 : i32
    %41 = arith.index_cast %40 : i32 to index
    %c0_23 = arith.constant 0 : index
    %c0_24 = arith.constant 0 : index
    %42 = vector.load %arg1[%41, %c0_23, %c0_24] : memref<32x8x72xbf16, #tpu.memory_space<vmem>>, vector<1x8x72xbf16>
    %43 = vector.shape_cast %42 : vector<1x8x72xbf16> to vector<8x72xbf16>
    %cst_25 = arith.constant dense<0.000000e+00> : vector<8x256xf32>
    %44 = tpu.matmul %43, %0, %cst_25 {dimension_numbers = #tpu.dot_dimension_numbers<[1], [0], [0], [1], [0, 0, 1, 1], [], []>} : vector<8x72xbf16>, vector<72x256xbf16>, vector<8x256xf32> -> vector<8x256xf32>
    %45 = arith.maximumf %39, %44 : vector<8x256xf32>
    %c16_i32_26 = arith.constant 16 : i32
    %46 = arith.addi %c16_i32_26, %c1_i32 : i32
    %47 = arith.index_cast %46 : i32 to index
    %c0_27 = arith.constant 0 : index
    %c0_28 = arith.constant 0 : index
    %48 = vector.load %arg1[%47, %c0_27, %c0_28] : memref<32x8x72xbf16, #tpu.memory_space<vmem>>, vector<1x8x72xbf16>
    %49 = vector.shape_cast %48 : vector<1x8x72xbf16> to vector<8x72xbf16>
    %cst_29 = arith.constant dense<0.000000e+00> : vector<8x256xf32>
    %50 = tpu.matmul %49, %0, %cst_29 {dimension_numbers = #tpu.dot_dimension_numbers<[1], [0], [0], [1], [0, 0, 1, 1], [], []>} : vector<8x72xbf16>, vector<72x256xbf16>, vector<8x256xf32> -> vector<8x256xf32>
    %51 = arith.maximumf %45, %50 : vector<8x256xf32>
    %c24_i32_30 = arith.constant 24 : i32
    %52 = arith.addi %c24_i32_30, %c1_i32 : i32
    %53 = arith.index_cast %52 : i32 to index
    %c0_31 = arith.constant 0 : index
    %c0_32 = arith.constant 0 : index
    %54 = vector.load %arg1[%53, %c0_31, %c0_32] : memref<32x8x72xbf16, #tpu.memory_space<vmem>>, vector<1x8x72xbf16>
    %55 = vector.shape_cast %54 : vector<1x8x72xbf16> to vector<8x72xbf16>
    %cst_33 = arith.constant dense<0.000000e+00> : vector<8x256xf32>
    %56 = tpu.matmul %55, %0, %cst_33 {dimension_numbers = #tpu.dot_dimension_numbers<[1], [0], [0], [1], [0, 0, 1, 1], [], []>} : vector<8x72xbf16>, vector<72x256xbf16>, vector<8x256xf32> -> vector<8x256xf32>
    %57 = arith.maximumf %51, %56 : vector<8x256xf32>
    %58 = arith.addf %57, %3 : vector<8x256xf32>
    %cst_34 = arith.constant 0.000000e+00 : f32
    %59 = vector.broadcast %cst_34 : f32 to vector<8x256xf32>
    %60 = arith.maximumf %58, %59 : vector<8x256xf32>
    %61 = arith.truncf %60 : vector<8x256xf32> to vector<8x256xbf16>
    %62 = arith.index_cast %c1_i32 : i32 to index
    %c0_35 = arith.constant 0 : index
    %c0_36 = arith.constant 0 : index
    %63 = vector.load %arg4[%62, %c0_35, %c0_36] : memref<8x256x128xbf16, #tpu.memory_space<vmem>>, vector<1x256x128xbf16>
    %64 = vector.shape_cast %63 : vector<1x256x128xbf16> to vector<256x128xbf16>
    %cst_37 = arith.constant dense<0.000000e+00> : vector<8x128xf32>
    %65 = tpu.matmul %61, %64, %cst_37 {dimension_numbers = #tpu.dot_dimension_numbers<[1], [0], [0], [1], [0, 0, 1, 1], [], []>} : vector<8x256xbf16>, vector<256x128xbf16>, vector<8x128xf32> -> vector<8x128xf32>
    %66 = arith.addf %35, %65 : vector<8x128xf32>
    %c2_i32 = arith.constant 2 : i32
    %67 = arith.index_cast %c2_i32 : i32 to index
    %c0_38 = arith.constant 0 : index
    %c0_39 = arith.constant 0 : index
    %68 = vector.load %arg1[%67, %c0_38, %c0_39] : memref<32x8x72xbf16, #tpu.memory_space<vmem>>, vector<1x8x72xbf16>
    %69 = vector.shape_cast %68 : vector<1x8x72xbf16> to vector<8x72xbf16>
    %cst_40 = arith.constant dense<0.000000e+00> : vector<8x256xf32>
    %70 = tpu.matmul %69, %0, %cst_40 {dimension_numbers = #tpu.dot_dimension_numbers<[1], [0], [0], [1], [0, 0, 1, 1], [], []>} : vector<8x72xbf16>, vector<72x256xbf16>, vector<8x256xf32> -> vector<8x256xf32>
    %c8_i32_41 = arith.constant 8 : i32
    %71 = arith.addi %c8_i32_41, %c2_i32 : i32
    %72 = arith.index_cast %71 : i32 to index
    %c0_42 = arith.constant 0 : index
    %c0_43 = arith.constant 0 : index
    %73 = vector.load %arg1[%72, %c0_42, %c0_43] : memref<32x8x72xbf16, #tpu.memory_space<vmem>>, vector<1x8x72xbf16>
    %74 = vector.shape_cast %73 : vector<1x8x72xbf16> to vector<8x72xbf16>
    %cst_44 = arith.constant dense<0.000000e+00> : vector<8x256xf32>
    %75 = tpu.matmul %74, %0, %cst_44 {dimension_numbers = #tpu.dot_dimension_numbers<[1], [0], [0], [1], [0, 0, 1, 1], [], []>} : vector<8x72xbf16>, vector<72x256xbf16>, vector<8x256xf32> -> vector<8x256xf32>
    %76 = arith.maximumf %70, %75 : vector<8x256xf32>
    %c16_i32_45 = arith.constant 16 : i32
    %77 = arith.addi %c16_i32_45, %c2_i32 : i32
    %78 = arith.index_cast %77 : i32 to index
    %c0_46 = arith.constant 0 : index
    %c0_47 = arith.constant 0 : index
    %79 = vector.load %arg1[%78, %c0_46, %c0_47] : memref<32x8x72xbf16, #tpu.memory_space<vmem>>, vector<1x8x72xbf16>
    %80 = vector.shape_cast %79 : vector<1x8x72xbf16> to vector<8x72xbf16>
    %cst_48 = arith.constant dense<0.000000e+00> : vector<8x256xf32>
    %81 = tpu.matmul %80, %0, %cst_48 {dimension_numbers = #tpu.dot_dimension_numbers<[1], [0], [0], [1], [0, 0, 1, 1], [], []>} : vector<8x72xbf16>, vector<72x256xbf16>, vector<8x256xf32> -> vector<8x256xf32>
    %82 = arith.maximumf %76, %81 : vector<8x256xf32>
    %c24_i32_49 = arith.constant 24 : i32
    %83 = arith.addi %c24_i32_49, %c2_i32 : i32
    %84 = arith.index_cast %83 : i32 to index
    %c0_50 = arith.constant 0 : index
    %c0_51 = arith.constant 0 : index
    %85 = vector.load %arg1[%84, %c0_50, %c0_51] : memref<32x8x72xbf16, #tpu.memory_space<vmem>>, vector<1x8x72xbf16>
    %86 = vector.shape_cast %85 : vector<1x8x72xbf16> to vector<8x72xbf16>
    %cst_52 = arith.constant dense<0.000000e+00> : vector<8x256xf32>
    %87 = tpu.matmul %86, %0, %cst_52 {dimension_numbers = #tpu.dot_dimension_numbers<[1], [0], [0], [1], [0, 0, 1, 1], [], []>} : vector<8x72xbf16>, vector<72x256xbf16>, vector<8x256xf32> -> vector<8x256xf32>
    %88 = arith.maximumf %82, %87 : vector<8x256xf32>
    %89 = arith.addf %88, %3 : vector<8x256xf32>
    %cst_53 = arith.constant 0.000000e+00 : f32
    %90 = vector.broadcast %cst_53 : f32 to vector<8x256xf32>
    %91 = arith.maximumf %89, %90 : vector<8x256xf32>
    %92 = arith.truncf %91 : vector<8x256xf32> to vector<8x256xbf16>
    %93 = arith.index_cast %c2_i32 : i32 to index
    %c0_54 = arith.constant 0 : index
    %c0_55 = arith.constant 0 : index
    %94 = vector.load %arg4[%93, %c0_54, %c0_55] : memref<8x256x128xbf16, #tpu.memory_space<vmem>>, vector<1x256x128xbf16>
    %95 = vector.shape_cast %94 : vector<1x256x128xbf16> to vector<256x128xbf16>
    %cst_56 = arith.constant dense<0.000000e+00> : vector<8x128xf32>
    %96 = tpu.matmul %92, %95, %cst_56 {dimension_numbers = #tpu.dot_dimension_numbers<[1], [0], [0], [1], [0, 0, 1, 1], [], []>} : vector<8x256xbf16>, vector<256x128xbf16>, vector<8x128xf32> -> vector<8x128xf32>
    %97 = arith.addf %66, %96 : vector<8x128xf32>
    %c3_i32 = arith.constant 3 : i32
    %98 = arith.index_cast %c3_i32 : i32 to index
    %c0_57 = arith.constant 0 : index
    %c0_58 = arith.constant 0 : index
    %99 = vector.load %arg1[%98, %c0_57, %c0_58] : memref<32x8x72xbf16, #tpu.memory_space<vmem>>, vector<1x8x72xbf16>
    %100 = vector.shape_cast %99 : vector<1x8x72xbf16> to vector<8x72xbf16>
    %cst_59 = arith.constant dense<0.000000e+00> : vector<8x256xf32>
    %101 = tpu.matmul %100, %0, %cst_59 {dimension_numbers = #tpu.dot_dimension_numbers<[1], [0], [0], [1], [0, 0, 1, 1], [], []>} : vector<8x72xbf16>, vector<72x256xbf16>, vector<8x256xf32> -> vector<8x256xf32>
    %c8_i32_60 = arith.constant 8 : i32
    %102 = arith.addi %c8_i32_60, %c3_i32 : i32
    %103 = arith.index_cast %102 : i32 to index
    %c0_61 = arith.constant 0 : index
    %c0_62 = arith.constant 0 : index
    %104 = vector.load %arg1[%103, %c0_61, %c0_62] : memref<32x8x72xbf16, #tpu.memory_space<vmem>>, vector<1x8x72xbf16>
    %105 = vector.shape_cast %104 : vector<1x8x72xbf16> to vector<8x72xbf16>
    %cst_63 = arith.constant dense<0.000000e+00> : vector<8x256xf32>
    %106 = tpu.matmul %105, %0, %cst_63 {dimension_numbers = #tpu.dot_dimension_numbers<[1], [0], [0], [1], [0, 0, 1, 1], [], []>} : vector<8x72xbf16>, vector<72x256xbf16>, vector<8x256xf32> -> vector<8x256xf32>
    %107 = arith.maximumf %101, %106 : vector<8x256xf32>
    %c16_i32_64 = arith.constant 16 : i32
    %108 = arith.addi %c16_i32_64, %c3_i32 : i32
    %109 = arith.index_cast %108 : i32 to index
    %c0_65 = arith.constant 0 : index
    %c0_66 = arith.constant 0 : index
    %110 = vector.load %arg1[%109, %c0_65, %c0_66] : memref<32x8x72xbf16, #tpu.memory_space<vmem>>, vector<1x8x72xbf16>
    %111 = vector.shape_cast %110 : vector<1x8x72xbf16> to vector<8x72xbf16>
    %cst_67 = arith.constant dense<0.000000e+00> : vector<8x256xf32>
    %112 = tpu.matmul %111, %0, %cst_67 {dimension_numbers = #tpu.dot_dimension_numbers<[1], [0], [0], [1], [0, 0, 1, 1], [], []>} : vector<8x72xbf16>, vector<72x256xbf16>, vector<8x256xf32> -> vector<8x256xf32>
    %113 = arith.maximumf %107, %112 : vector<8x256xf32>
    %c24_i32_68 = arith.constant 24 : i32
    %114 = arith.addi %c24_i32_68, %c3_i32 : i32
    %115 = arith.index_cast %114 : i32 to index
    %c0_69 = arith.constant 0 : index
    %c0_70 = arith.constant 0 : index
    %116 = vector.load %arg1[%115, %c0_69, %c0_70] : memref<32x8x72xbf16, #tpu.memory_space<vmem>>, vector<1x8x72xbf16>
    %117 = vector.shape_cast %116 : vector<1x8x72xbf16> to vector<8x72xbf16>
    %cst_71 = arith.constant dense<0.000000e+00> : vector<8x256xf32>
    %118 = tpu.matmul %117, %0, %cst_71 {dimension_numbers = #tpu.dot_dimension_numbers<[1], [0], [0], [1], [0, 0, 1, 1], [], []>} : vector<8x72xbf16>, vector<72x256xbf16>, vector<8x256xf32> -> vector<8x256xf32>
    %119 = arith.maximumf %113, %118 : vector<8x256xf32>
    %120 = arith.addf %119, %3 : vector<8x256xf32>
    %cst_72 = arith.constant 0.000000e+00 : f32
    %121 = vector.broadcast %cst_72 : f32 to vector<8x256xf32>
    %122 = arith.maximumf %120, %121 : vector<8x256xf32>
    %123 = arith.truncf %122 : vector<8x256xf32> to vector<8x256xbf16>
    %124 = arith.index_cast %c3_i32 : i32 to index
    %c0_73 = arith.constant 0 : index
    %c0_74 = arith.constant 0 : index
    %125 = vector.load %arg4[%124, %c0_73, %c0_74] : memref<8x256x128xbf16, #tpu.memory_space<vmem>>, vector<1x256x128xbf16>
    %126 = vector.shape_cast %125 : vector<1x256x128xbf16> to vector<256x128xbf16>
    %cst_75 = arith.constant dense<0.000000e+00> : vector<8x128xf32>
    %127 = tpu.matmul %123, %126, %cst_75 {dimension_numbers = #tpu.dot_dimension_numbers<[1], [0], [0], [1], [0, 0, 1, 1], [], []>} : vector<8x256xbf16>, vector<256x128xbf16>, vector<8x128xf32> -> vector<8x128xf32>
    %128 = arith.addf %97, %127 : vector<8x128xf32>
    %c4_i32 = arith.constant 4 : i32
    %129 = arith.index_cast %c4_i32 : i32 to index
    %c0_76 = arith.constant 0 : index
    %c0_77 = arith.constant 0 : index
    %130 = vector.load %arg1[%129, %c0_76, %c0_77] : memref<32x8x72xbf16, #tpu.memory_space<vmem>>, vector<1x8x72xbf16>
    %131 = vector.shape_cast %130 : vector<1x8x72xbf16> to vector<8x72xbf16>
    %cst_78 = arith.constant dense<0.000000e+00> : vector<8x256xf32>
    %132 = tpu.matmul %131, %0, %cst_78 {dimension_numbers = #tpu.dot_dimension_numbers<[1], [0], [0], [1], [0, 0, 1, 1], [], []>} : vector<8x72xbf16>, vector<72x256xbf16>, vector<8x256xf32> -> vector<8x256xf32>
    %c8_i32_79 = arith.constant 8 : i32
    %133 = arith.addi %c8_i32_79, %c4_i32 : i32
    %134 = arith.index_cast %133 : i32 to index
    %c0_80 = arith.constant 0 : index
    %c0_81 = arith.constant 0 : index
    %135 = vector.load %arg1[%134, %c0_80, %c0_81] : memref<32x8x72xbf16, #tpu.memory_space<vmem>>, vector<1x8x72xbf16>
    %136 = vector.shape_cast %135 : vector<1x8x72xbf16> to vector<8x72xbf16>
    %cst_82 = arith.constant dense<0.000000e+00> : vector<8x256xf32>
    %137 = tpu.matmul %136, %0, %cst_82 {dimension_numbers = #tpu.dot_dimension_numbers<[1], [0], [0], [1], [0, 0, 1, 1], [], []>} : vector<8x72xbf16>, vector<72x256xbf16>, vector<8x256xf32> -> vector<8x256xf32>
    %138 = arith.maximumf %132, %137 : vector<8x256xf32>
    %c16_i32_83 = arith.constant 16 : i32
    %139 = arith.addi %c16_i32_83, %c4_i32 : i32
    %140 = arith.index_cast %139 : i32 to index
    %c0_84 = arith.constant 0 : index
    %c0_85 = arith.constant 0 : index
    %141 = vector.load %arg1[%140, %c0_84, %c0_85] : memref<32x8x72xbf16, #tpu.memory_space<vmem>>, vector<1x8x72xbf16>
    %142 = vector.shape_cast %141 : vector<1x8x72xbf16> to vector<8x72xbf16>
    %cst_86 = arith.constant dense<0.000000e+00> : vector<8x256xf32>
    %143 = tpu.matmul %142, %0, %cst_86 {dimension_numbers = #tpu.dot_dimension_numbers<[1], [0], [0], [1], [0, 0, 1, 1], [], []>} : vector<8x72xbf16>, vector<72x256xbf16>, vector<8x256xf32> -> vector<8x256xf32>
    %144 = arith.maximumf %138, %143 : vector<8x256xf32>
    %c24_i32_87 = arith.constant 24 : i32
    %145 = arith.addi %c24_i32_87, %c4_i32 : i32
    %146 = arith.index_cast %145 : i32 to index
    %c0_88 = arith.constant 0 : index
    %c0_89 = arith.constant 0 : index
    %147 = vector.load %arg1[%146, %c0_88, %c0_89] : memref<32x8x72xbf16, #tpu.memory_space<vmem>>, vector<1x8x72xbf16>
    %148 = vector.shape_cast %147 : vector<1x8x72xbf16> to vector<8x72xbf16>
    %cst_90 = arith.constant dense<0.000000e+00> : vector<8x256xf32>
    %149 = tpu.matmul %148, %0, %cst_90 {dimension_numbers = #tpu.dot_dimension_numbers<[1], [0], [0], [1], [0, 0, 1, 1], [], []>} : vector<8x72xbf16>, vector<72x256xbf16>, vector<8x256xf32> -> vector<8x256xf32>
    %150 = arith.maximumf %144, %149 : vector<8x256xf32>
    %151 = arith.addf %150, %3 : vector<8x256xf32>
    %cst_91 = arith.constant 0.000000e+00 : f32
    %152 = vector.broadcast %cst_91 : f32 to vector<8x256xf32>
    %153 = arith.maximumf %151, %152 : vector<8x256xf32>
    %154 = arith.truncf %153 : vector<8x256xf32> to vector<8x256xbf16>
    %155 = arith.index_cast %c4_i32 : i32 to index
    %c0_92 = arith.constant 0 : index
    %c0_93 = arith.constant 0 : index
    %156 = vector.load %arg4[%155, %c0_92, %c0_93] : memref<8x256x128xbf16, #tpu.memory_space<vmem>>, vector<1x256x128xbf16>
    %157 = vector.shape_cast %156 : vector<1x256x128xbf16> to vector<256x128xbf16>
    %cst_94 = arith.constant dense<0.000000e+00> : vector<8x128xf32>
    %158 = tpu.matmul %154, %157, %cst_94 {dimension_numbers = #tpu.dot_dimension_numbers<[1], [0], [0], [1], [0, 0, 1, 1], [], []>} : vector<8x256xbf16>, vector<256x128xbf16>, vector<8x128xf32> -> vector<8x128xf32>
    %159 = arith.addf %128, %158 : vector<8x128xf32>
    %c5_i32 = arith.constant 5 : i32
    %160 = arith.index_cast %c5_i32 : i32 to index
    %c0_95 = arith.constant 0 : index
    %c0_96 = arith.constant 0 : index
    %161 = vector.load %arg1[%160, %c0_95, %c0_96] : memref<32x8x72xbf16, #tpu.memory_space<vmem>>, vector<1x8x72xbf16>
    %162 = vector.shape_cast %161 : vector<1x8x72xbf16> to vector<8x72xbf16>
    %cst_97 = arith.constant dense<0.000000e+00> : vector<8x256xf32>
    %163 = tpu.matmul %162, %0, %cst_97 {dimension_numbers = #tpu.dot_dimension_numbers<[1], [0], [0], [1], [0, 0, 1, 1], [], []>} : vector<8x72xbf16>, vector<72x256xbf16>, vector<8x256xf32> -> vector<8x256xf32>
    %c8_i32_98 = arith.constant 8 : i32
    %164 = arith.addi %c8_i32_98, %c5_i32 : i32
    %165 = arith.index_cast %164 : i32 to index
    %c0_99 = arith.constant 0 : index
    %c0_100 = arith.constant 0 : index
    %166 = vector.load %arg1[%165, %c0_99, %c0_100] : memref<32x8x72xbf16, #tpu.memory_space<vmem>>, vector<1x8x72xbf16>
    %167 = vector.shape_cast %166 : vector<1x8x72xbf16> to vector<8x72xbf16>
    %cst_101 = arith.constant dense<0.000000e+00> : vector<8x256xf32>
    %168 = tpu.matmul %167, %0, %cst_101 {dimension_numbers = #tpu.dot_dimension_numbers<[1], [0], [0], [1], [0, 0, 1, 1], [], []>} : vector<8x72xbf16>, vector<72x256xbf16>, vector<8x256xf32> -> vector<8x256xf32>
    %169 = arith.maximumf %163, %168 : vector<8x256xf32>
    %c16_i32_102 = arith.constant 16 : i32
    %170 = arith.addi %c16_i32_102, %c5_i32 : i32
    %171 = arith.index_cast %170 : i32 to index
    %c0_103 = arith.constant 0 : index
    %c0_104 = arith.constant 0 : index
    %172 = vector.load %arg1[%171, %c0_103, %c0_104] : memref<32x8x72xbf16, #tpu.memory_space<vmem>>, vector<1x8x72xbf16>
    %173 = vector.shape_cast %172 : vector<1x8x72xbf16> to vector<8x72xbf16>
    %cst_105 = arith.constant dense<0.000000e+00> : vector<8x256xf32>
    %174 = tpu.matmul %173, %0, %cst_105 {dimension_numbers = #tpu.dot_dimension_numbers<[1], [0], [0], [1], [0, 0, 1, 1], [], []>} : vector<8x72xbf16>, vector<72x256xbf16>, vector<8x256xf32> -> vector<8x256xf32>
    %175 = arith.maximumf %169, %174 : vector<8x256xf32>
    %c24_i32_106 = arith.constant 24 : i32
    %176 = arith.addi %c24_i32_106, %c5_i32 : i32
    %177 = arith.index_cast %176 : i32 to index
    %c0_107 = arith.constant 0 : index
    %c0_108 = arith.constant 0 : index
    %178 = vector.load %arg1[%177, %c0_107, %c0_108] : memref<32x8x72xbf16, #tpu.memory_space<vmem>>, vector<1x8x72xbf16>
    %179 = vector.shape_cast %178 : vector<1x8x72xbf16> to vector<8x72xbf16>
    %cst_109 = arith.constant dense<0.000000e+00> : vector<8x256xf32>
    %180 = tpu.matmul %179, %0, %cst_109 {dimension_numbers = #tpu.dot_dimension_numbers<[1], [0], [0], [1], [0, 0, 1, 1], [], []>} : vector<8x72xbf16>, vector<72x256xbf16>, vector<8x256xf32> -> vector<8x256xf32>
    %181 = arith.maximumf %175, %180 : vector<8x256xf32>
    %182 = arith.addf %181, %3 : vector<8x256xf32>
    %cst_110 = arith.constant 0.000000e+00 : f32
    %183 = vector.broadcast %cst_110 : f32 to vector<8x256xf32>
    %184 = arith.maximumf %182, %183 : vector<8x256xf32>
    %185 = arith.truncf %184 : vector<8x256xf32> to vector<8x256xbf16>
    %186 = arith.index_cast %c5_i32 : i32 to index
    %c0_111 = arith.constant 0 : index
    %c0_112 = arith.constant 0 : index
    %187 = vector.load %arg4[%186, %c0_111, %c0_112] : memref<8x256x128xbf16, #tpu.memory_space<vmem>>, vector<1x256x128xbf16>
    %188 = vector.shape_cast %187 : vector<1x256x128xbf16> to vector<256x128xbf16>
    %cst_113 = arith.constant dense<0.000000e+00> : vector<8x128xf32>
    %189 = tpu.matmul %185, %188, %cst_113 {dimension_numbers = #tpu.dot_dimension_numbers<[1], [0], [0], [1], [0, 0, 1, 1], [], []>} : vector<8x256xbf16>, vector<256x128xbf16>, vector<8x128xf32> -> vector<8x128xf32>
    %190 = arith.addf %159, %189 : vector<8x128xf32>
    %c6_i32 = arith.constant 6 : i32
    %191 = arith.index_cast %c6_i32 : i32 to index
    %c0_114 = arith.constant 0 : index
    %c0_115 = arith.constant 0 : index
    %192 = vector.load %arg1[%191, %c0_114, %c0_115] : memref<32x8x72xbf16, #tpu.memory_space<vmem>>, vector<1x8x72xbf16>
    %193 = vector.shape_cast %192 : vector<1x8x72xbf16> to vector<8x72xbf16>
    %cst_116 = arith.constant dense<0.000000e+00> : vector<8x256xf32>
    %194 = tpu.matmul %193, %0, %cst_116 {dimension_numbers = #tpu.dot_dimension_numbers<[1], [0], [0], [1], [0, 0, 1, 1], [], []>} : vector<8x72xbf16>, vector<72x256xbf16>, vector<8x256xf32> -> vector<8x256xf32>
    %c8_i32_117 = arith.constant 8 : i32
    %195 = arith.addi %c8_i32_117, %c6_i32 : i32
    %196 = arith.index_cast %195 : i32 to index
    %c0_118 = arith.constant 0 : index
    %c0_119 = arith.constant 0 : index
    %197 = vector.load %arg1[%196, %c0_118, %c0_119] : memref<32x8x72xbf16, #tpu.memory_space<vmem>>, vector<1x8x72xbf16>
    %198 = vector.shape_cast %197 : vector<1x8x72xbf16> to vector<8x72xbf16>
    %cst_120 = arith.constant dense<0.000000e+00> : vector<8x256xf32>
    %199 = tpu.matmul %198, %0, %cst_120 {dimension_numbers = #tpu.dot_dimension_numbers<[1], [0], [0], [1], [0, 0, 1, 1], [], []>} : vector<8x72xbf16>, vector<72x256xbf16>, vector<8x256xf32> -> vector<8x256xf32>
    %200 = arith.maximumf %194, %199 : vector<8x256xf32>
    %c16_i32_121 = arith.constant 16 : i32
    %201 = arith.addi %c16_i32_121, %c6_i32 : i32
    %202 = arith.index_cast %201 : i32 to index
    %c0_122 = arith.constant 0 : index
    %c0_123 = arith.constant 0 : index
    %203 = vector.load %arg1[%202, %c0_122, %c0_123] : memref<32x8x72xbf16, #tpu.memory_space<vmem>>, vector<1x8x72xbf16>
    %204 = vector.shape_cast %203 : vector<1x8x72xbf16> to vector<8x72xbf16>
    %cst_124 = arith.constant dense<0.000000e+00> : vector<8x256xf32>
    %205 = tpu.matmul %204, %0, %cst_124 {dimension_numbers = #tpu.dot_dimension_numbers<[1], [0], [0], [1], [0, 0, 1, 1], [], []>} : vector<8x72xbf16>, vector<72x256xbf16>, vector<8x256xf32> -> vector<8x256xf32>
    %206 = arith.maximumf %200, %205 : vector<8x256xf32>
    %c24_i32_125 = arith.constant 24 : i32
    %207 = arith.addi %c24_i32_125, %c6_i32 : i32
    %208 = arith.index_cast %207 : i32 to index
    %c0_126 = arith.constant 0 : index
    %c0_127 = arith.constant 0 : index
    %209 = vector.load %arg1[%208, %c0_126, %c0_127] : memref<32x8x72xbf16, #tpu.memory_space<vmem>>, vector<1x8x72xbf16>
    %210 = vector.shape_cast %209 : vector<1x8x72xbf16> to vector<8x72xbf16>
    %cst_128 = arith.constant dense<0.000000e+00> : vector<8x256xf32>
    %211 = tpu.matmul %210, %0, %cst_128 {dimension_numbers = #tpu.dot_dimension_numbers<[1], [0], [0], [1], [0, 0, 1, 1], [], []>} : vector<8x72xbf16>, vector<72x256xbf16>, vector<8x256xf32> -> vector<8x256xf32>
    %212 = arith.maximumf %206, %211 : vector<8x256xf32>
    %213 = arith.addf %212, %3 : vector<8x256xf32>
    %cst_129 = arith.constant 0.000000e+00 : f32
    %214 = vector.broadcast %cst_129 : f32 to vector<8x256xf32>
    %215 = arith.maximumf %213, %214 : vector<8x256xf32>
    %216 = arith.truncf %215 : vector<8x256xf32> to vector<8x256xbf16>
    %217 = arith.index_cast %c6_i32 : i32 to index
    %c0_130 = arith.constant 0 : index
    %c0_131 = arith.constant 0 : index
    %218 = vector.load %arg4[%217, %c0_130, %c0_131] : memref<8x256x128xbf16, #tpu.memory_space<vmem>>, vector<1x256x128xbf16>
    %219 = vector.shape_cast %218 : vector<1x256x128xbf16> to vector<256x128xbf16>
    %cst_132 = arith.constant dense<0.000000e+00> : vector<8x128xf32>
    %220 = tpu.matmul %216, %219, %cst_132 {dimension_numbers = #tpu.dot_dimension_numbers<[1], [0], [0], [1], [0, 0, 1, 1], [], []>} : vector<8x256xbf16>, vector<256x128xbf16>, vector<8x128xf32> -> vector<8x128xf32>
    %221 = arith.addf %190, %220 : vector<8x128xf32>
    %c7_i32 = arith.constant 7 : i32
    %222 = arith.index_cast %c7_i32 : i32 to index
    %c0_133 = arith.constant 0 : index
    %c0_134 = arith.constant 0 : index
    %223 = vector.load %arg1[%222, %c0_133, %c0_134] : memref<32x8x72xbf16, #tpu.memory_space<vmem>>, vector<1x8x72xbf16>
    %224 = vector.shape_cast %223 : vector<1x8x72xbf16> to vector<8x72xbf16>
    %cst_135 = arith.constant dense<0.000000e+00> : vector<8x256xf32>
    %225 = tpu.matmul %224, %0, %cst_135 {dimension_numbers = #tpu.dot_dimension_numbers<[1], [0], [0], [1], [0, 0, 1, 1], [], []>} : vector<8x72xbf16>, vector<72x256xbf16>, vector<8x256xf32> -> vector<8x256xf32>
    %c8_i32_136 = arith.constant 8 : i32
    %226 = arith.addi %c8_i32_136, %c7_i32 : i32
    %227 = arith.index_cast %226 : i32 to index
    %c0_137 = arith.constant 0 : index
    %c0_138 = arith.constant 0 : index
    %228 = vector.load %arg1[%227, %c0_137, %c0_138] : memref<32x8x72xbf16, #tpu.memory_space<vmem>>, vector<1x8x72xbf16>
    %229 = vector.shape_cast %228 : vector<1x8x72xbf16> to vector<8x72xbf16>
    %cst_139 = arith.constant dense<0.000000e+00> : vector<8x256xf32>
    %230 = tpu.matmul %229, %0, %cst_139 {dimension_numbers = #tpu.dot_dimension_numbers<[1], [0], [0], [1], [0, 0, 1, 1], [], []>} : vector<8x72xbf16>, vector<72x256xbf16>, vector<8x256xf32> -> vector<8x256xf32>
    %231 = arith.maximumf %225, %230 : vector<8x256xf32>
    %c16_i32_140 = arith.constant 16 : i32
    %232 = arith.addi %c16_i32_140, %c7_i32 : i32
    %233 = arith.index_cast %232 : i32 to index
    %c0_141 = arith.constant 0 : index
    %c0_142 = arith.constant 0 : index
    %234 = vector.load %arg1[%233, %c0_141, %c0_142] : memref<32x8x72xbf16, #tpu.memory_space<vmem>>, vector<1x8x72xbf16>
    %235 = vector.shape_cast %234 : vector<1x8x72xbf16> to vector<8x72xbf16>
    %cst_143 = arith.constant dense<0.000000e+00> : vector<8x256xf32>
    %236 = tpu.matmul %235, %0, %cst_143 {dimension_numbers = #tpu.dot_dimension_numbers<[1], [0], [0], [1], [0, 0, 1, 1], [], []>} : vector<8x72xbf16>, vector<72x256xbf16>, vector<8x256xf32> -> vector<8x256xf32>
    %237 = arith.maximumf %231, %236 : vector<8x256xf32>
    %c24_i32_144 = arith.constant 24 : i32
    %238 = arith.addi %c24_i32_144, %c7_i32 : i32
    %239 = arith.index_cast %238 : i32 to index
    %c0_145 = arith.constant 0 : index
    %c0_146 = arith.constant 0 : index
    %240 = vector.load %arg1[%239, %c0_145, %c0_146] : memref<32x8x72xbf16, #tpu.memory_space<vmem>>, vector<1x8x72xbf16>
    %241 = vector.shape_cast %240 : vector<1x8x72xbf16> to vector<8x72xbf16>
    %cst_147 = arith.constant dense<0.000000e+00> : vector<8x256xf32>
    %242 = tpu.matmul %241, %0, %cst_147 {dimension_numbers = #tpu.dot_dimension_numbers<[1], [0], [0], [1], [0, 0, 1, 1], [], []>} : vector<8x72xbf16>, vector<72x256xbf16>, vector<8x256xf32> -> vector<8x256xf32>
    %243 = arith.maximumf %237, %242 : vector<8x256xf32>
    %244 = arith.addf %243, %3 : vector<8x256xf32>
    %cst_148 = arith.constant 0.000000e+00 : f32
    %245 = vector.broadcast %cst_148 : f32 to vector<8x256xf32>
    %246 = arith.maximumf %244, %245 : vector<8x256xf32>
    %247 = arith.truncf %246 : vector<8x256xf32> to vector<8x256xbf16>
    %248 = arith.index_cast %c7_i32 : i32 to index
    %c0_149 = arith.constant 0 : index
    %c0_150 = arith.constant 0 : index
    %249 = vector.load %arg4[%248, %c0_149, %c0_150] : memref<8x256x128xbf16, #tpu.memory_space<vmem>>, vector<1x256x128xbf16>
    %250 = vector.shape_cast %249 : vector<1x256x128xbf16> to vector<256x128xbf16>
    %cst_151 = arith.constant dense<0.000000e+00> : vector<8x128xf32>
    %251 = tpu.matmul %247, %250, %cst_151 {dimension_numbers = #tpu.dot_dimension_numbers<[1], [0], [0], [1], [0, 0, 1, 1], [], []>} : vector<8x256xbf16>, vector<256x128xbf16>, vector<8x128xf32> -> vector<8x128xf32>
    %252 = arith.addf %221, %251 : vector<8x128xf32>
    %c8_i32_152 = arith.constant 8 : i32
    %c0_153 = arith.constant 0 : index
    %c0_154 = arith.constant 0 : index
    %253 = vector.load %arg5[%c0_153, %c0_154] : memref<1x128xf32, #tpu.memory_space<vmem>>, vector<1x128xf32>
    %254 = vector.broadcast %253 : vector<1x128xf32> to vector<8x128xf32>
    %255 = arith.addf %252, %254 : vector<8x128xf32>
    %cst_155 = arith.constant 0.000000e+00 : f32
    %256 = vector.broadcast %cst_155 : f32 to vector<8x128xf32>
    %257 = arith.maximumf %255, %256 : vector<8x128xf32>
    %258 = arith.truncf %257 : vector<8x128xf32> to vector<8x128xbf16>
    %c0_156 = arith.constant 0 : index
    %c0_157 = arith.constant 0 : index
    %259 = vector.load %arg6[%c0_156, %c0_157] : memref<128x128xbf16, #tpu.memory_space<vmem>>, vector<128x128xbf16>
    %cst_158 = arith.constant dense<0.000000e+00> : vector<8x128xf32>
    %260 = tpu.matmul %258, %259, %cst_158 {dimension_numbers = #tpu.dot_dimension_numbers<[1], [0], [0], [1], [0, 0, 1, 1], [], []>} : vector<8x128xbf16>, vector<128x128xbf16>, vector<8x128xf32> -> vector<8x128xf32>
    %c0_159 = arith.constant 0 : index
    %c0_160 = arith.constant 0 : index
    %261 = vector.load %arg7[%c0_159, %c0_160] : memref<1x128xf32, #tpu.memory_space<vmem>>, vector<1x128xf32>
    %262 = vector.broadcast %261 : vector<1x128xf32> to vector<8x128xf32>
    %263 = arith.addf %260, %262 : vector<8x128xf32>
    %cst_161 = arith.constant dense<0xFF800000> : vector<8xf32>
    %264 = vector.multi_reduction <maximumf>, %263, %cst_161 [1] : vector<8x128xf32> to vector<8xf32>
    %265 = vector.shape_cast %264 : vector<8xf32> to vector<8x1xf32>
    %266 = vector.broadcast %265 : vector<8x1xf32> to vector<8x128xf32>
    %267 = arith.subf %263, %266 : vector<8x128xf32>
    %268 = math.exp %267 : vector<8x128xf32>
    %cst_162 = arith.constant dense<0.000000e+00> : vector<8xf32>
    %269 = vector.multi_reduction <add>, %268, %cst_162 [1] : vector<8x128xf32> to vector<8xf32>
    %270 = vector.shape_cast %269 : vector<8xf32> to vector<8x1xf32>
    %271 = tpu.reciprocal %270 {approx = true} : vector<8x1xf32> -> vector<8x1xf32>
    %272 = vector.broadcast %271 : vector<8x1xf32> to vector<8x128xf32>
    %273 = arith.mulf %268, %272 : vector<8x128xf32>
    %c0_163 = arith.constant 0 : index
    %c0_164 = arith.constant 0 : index
    %274 = vector.load %arg8[%c0_163, %c0_164] : memref<8x128xf32, #tpu.memory_space<vmem>>, vector<8x128xf32>
    tpu.vector_store %arg8[%c0_163, %c0_164], %273 {strides = array<i32>} : memref<8x128xf32, #tpu.memory_space<vmem>>, vector<8x128xf32>,
    return
  }
  func.func @transform_0(%arg0: i32) -> (i32, i32, i32) {
    %c0_i32 = arith.constant 0 : i32
    %c0_i32_0 = arith.constant 0 : i32
    %c0_i32_1 = arith.constant 0 : i32
    return %c0_i32, %arg0, %c0_i32_0 : i32, i32, i32
  }
  func.func @transform_1(%arg0: i32) -> (i32, i32) {
    %c0_i32 = arith.constant 0 : i32
    %c0_i32_0 = arith.constant 0 : i32
    %c0_i32_1 = arith.constant 0 : i32
    return %c0_i32, %c0_i32_0 : i32, i32
  }
  func.func @transform_2(%arg0: i32) -> (i32, i32) {
    %c0_i32 = arith.constant 0 : i32
    %c0_i32_0 = arith.constant 0 : i32
    %c0_i32_1 = arith.constant 0 : i32
    return %c0_i32, %c0_i32_0 : i32, i32
  }
  func.func @transform_3(%arg0: i32) -> (i32, i32, i32) {
    %c0_i32 = arith.constant 0 : i32
    %c0_i32_0 = arith.constant 0 : i32
    %c0_i32_1 = arith.constant 0 : i32
    %c0_i32_2 = arith.constant 0 : i32
    return %c0_i32, %c0_i32_0, %c0_i32_1 : i32, i32, i32
  }
  func.func @transform_4(%arg0: i32) -> (i32, i32) {
    %c0_i32 = arith.constant 0 : i32
    %c0_i32_0 = arith.constant 0 : i32
    %c0_i32_1 = arith.constant 0 : i32
    return %c0_i32, %c0_i32_0 : i32, i32
  }
  func.func @transform_5(%arg0: i32) -> (i32, i32) {
    %c0_i32 = arith.constant 0 : i32
    %c0_i32_0 = arith.constant 0 : i32
    %c0_i32_1 = arith.constant 0 : i32
    return %c0_i32, %c0_i32_0 : i32, i32
  }
  func.func @transform_6(%arg0: i32) -> (i32, i32) {
    %c0_i32 = arith.constant 0 : i32
    %c0_i32_0 = arith.constant 0 : i32
    %c0_i32_1 = arith.constant 0 : i32
    return %c0_i32, %c0_i32_0 : i32, i32
  }
  func.func @transform_7(%arg0: i32) -> (i32, i32) {
    %c0_i32 = arith.constant 0 : i32
    %c0_i32_0 = arith.constant 0 : i32
    return %arg0, %c0_i32 : i32, i32
  }
}

</mosaic_0001>

<bundles_post_ra>
// kernel: tpu_custom_call.1
= control target key start
LH: loop header
LB: loop body
LE: loop exit
PB: predicated region body
PF: predicated region fallthrough
CT: control target
= control target key end

     0   :  { %12 = vsyncpa [#allocation3], 0  ;;  %s4625_s0 = inlined_call_operand.hbm [shape: bf16[32,8,72], index: 0, kind: input, shape index: {}]   ;;  %s4626_s1 = inlined_call_operand.hbm [shape: bf16[72,256], index: 1, kind: input, shape index: {}]   ;;  %s4627_s2 = inlined_call_operand.vmem [shape: f32[1,256], index: 2, kind: input, shape index: {}]   ;;  %s4628_s3 = inlined_call_operand.hbm [shape: bf16[8,256,128], index: 3, kind: input, shape index: {}]   ;;  %s4629_s4 = inlined_call_operand.vmem [shape: f32[1,128], index: 4, kind: input, shape index: {}]   ;;  %s4630_s5 = inlined_call_operand.hbm [shape: bf16[128,128], index: 5, kind: input, shape index: {}]   ;;  %s4631_s6 = inlined_call_operand.vmem [shape: f32[1,128], index: 6, kind: input, shape index: {}]   ;;  %s4632_s7 = inlined_call_operand.hbm [shape: f32[8,128], index: 7, kind: output, shape index: {}]  }
   0x1   :  { %13 = vsyncpa [#allocation6], 0 }
   0x2   :  { %14 = vsyncpa [#allocation9], 0 }
   0x3   :  { %15 = vsyncpa [#allocation4], 0  ;;  %s3946_s24 = smov [#allocation5]   ;;  %s3828_s28 = scalar_lea.hbm %s4626_s1, 1152 }
   0x4   :  { %s33_s25 = sshll.u32 %s3946_s24, 4  ;;  %p3829_p0 = scmp.ne.s32.totalorder %s4626_s1, %s3828_s28  ;;  %s34_s25 = int_to_ptr.vmem [resolvable:$true] %s33_s25 }
   0x5   :  { %p3832_p1 = scmp.lt.u32.totalorder %s3828_s28, %s4626_s1 }
   0x7   :  { %p3834_p2 = pnand %p3832_p1, %p3829_p0 }
   0x9   :  { %3837 = shalt.err (!%p3834_p2)
}
   0xa   :  { %s3838_s10 = scalar_lea.vmem %s34_s25, 1152  ;;  %p3843_p4 = scmp.lt.s32.totalorder %s34_s25, %s34_s25 }
   0xb   :  { %p3839_p3 = scmp.ne.s32.totalorder %s34_s25, %s3838_s10  ;;  %p3844_p5 = scmp.lt.s32.totalorder %s3838_s10, %s3838_s10 }
   0xd   :  { %p3845_p6 = por %p3844_p5, %p3843_p4 }
   0xf   :  { %p3846_p7 = pnand %p3845_p6, %p3839_p3 }
  0x11   :  { %3849 = shalt.err (!%p3846_p7)
}
  0x12   :  { %s3947_s11 = smov 128   ;;  %s3948_s12 = smov 8  }
  0x13   :  { %39 = dma.hbm_to_vmem [thread:$0]  %s4626_s1, 1152, %s34_s25, [#allocation6], %s3947_s11, %s3947_s11, %s3948_s12  }
  0x14   :  { %s3949_s15 = smov [#allocation2]   ;;  %s3850_s19 = scalar_lea.hbm %s4625_s0, 2048 }
  0x15   :  { %s21_s16 = sshll.u32 %s3949_s15, 4  ;;  %p3851_p8 = scmp.ne.s32.totalorder %s4625_s0, %s3850_s19  ;;  %s22_s16 = int_to_ptr.vmem [resolvable:$true] %s21_s16 }
  0x16   :  { %p3854_p9 = scmp.lt.u32.totalorder %s3850_s19, %s4625_s0 }
  0x18   :  { %p3856_p10 = pnand %p3854_p9, %p3851_p8 }
  0x1a   :  { %3859 = shalt.err (!%p3856_p10)
}
  0x1b   :  { %s3860_s24 = scalar_lea.vmem %s22_s16, 2048  ;;  %p3865_p12 = scmp.lt.s32.totalorder %s22_s16, %s22_s16 }
  0x1c   :  { %p3861_p11 = scmp.ne.s32.totalorder %s22_s16, %s3860_s24  ;;  %p3866_p13 = scmp.lt.s32.totalorder %s3860_s24, %s3860_s24 }
  0x1e   :  { %p3867_p0 = por %p3866_p13, %p3865_p12 }
  0x20   :  { %p3868_p1 = pnand %p3867_p0, %p3861_p11 }
  0x22   :  { %3871 = shalt.err (!%p3868_p1)
}
  0x23   :  { %s3950_s1 = smov 64   ;;  %s3951_s25 = smov 4  }
  0x24   :  { %27 = dma.hbm_to_vmem [thread:$0]  %s4625_s0, 2048, %s22_s16, [#allocation3], %s3950_s1, %s3950_s1, %s3951_s25  }
  0x25   :  { %s3952_s28 = smov [#allocation7]   ;;  %s3953_s30 = smov [#allocation8]  }
  0x26   :  { %s47_s29 = sshll.u32 %s3952_s28, 4  ;;  %s61_s8 = sshll.u32 %s3953_s30, 4  ;;  %s48_s29 = int_to_ptr.vmem [resolvable:$true] %s47_s29  ;;  %s4025_s8 = int_to_ptr.vmem [resolvable:$true] %s61_s8 }
  0x27   :  { %s3872_s11 = scalar_lea.hbm %s4628_s3, 16384 }
  0x28   :  { %p3873_p2 = scmp.ne.s32.totalorder %s4628_s3, %s3872_s11  ;;  %p3876_p3 = scmp.lt.u32.totalorder %s3872_s11, %s4628_s3 }
  0x2a   :  { %p3878_p4 = pnand %p3876_p3, %p3873_p2 }
  0x2c   :  { %3881 = shalt.err (!%p3878_p4)
}
  0x2d   :  { %s3882_s0 = scalar_lea.vmem %s48_s29, 16384  ;;  %p3887_p6 = scmp.lt.s32.totalorder %s48_s29, %s48_s29 }
  0x2e   :  { %p3883_p5 = scmp.ne.s32.totalorder %s48_s29, %s3882_s0  ;;  %p3888_p7 = scmp.lt.s32.totalorder %s3882_s0, %s3882_s0 }
  0x30   :  { %p3889_p8 = por %p3888_p7, %p3887_p6 }
  0x32   :  { %p3890_p9 = pnand %p3889_p8, %p3883_p5 }
  0x34   :  { %3893 = shalt.err (!%p3890_p9)
}
  0x35   :  { %53 = dma.hbm_to_vmem [thread:$0]  %s4628_s3, 16384, %s48_s29, [#allocation6], %s3950_s1, %s3950_s1, %s3951_s25  }
  0x36   :  { %s3894_s20 = scalar_lea.hbm %s4630_s5, 1024 }
  0x37   :  { %p3895_p10 = scmp.ne.s32.totalorder %s4630_s5, %s3894_s20  ;;  %p3898_p11 = scmp.lt.u32.totalorder %s3894_s20, %s4630_s5 }
  0x39   :  { %p3900_p12 = pnand %p3898_p11, %p3895_p10 }
  0x3b   :  { %3903 = shalt.err (!%p3900_p12)
}
  0x3c   :  { %s3904_s26 = scalar_lea.vmem %s4025_s8, 1024  ;;  %p3909_p0 = scmp.lt.s32.totalorder %s4025_s8, %s4025_s8 }
  0x3d   :  { %p3905_p13 = scmp.ne.s32.totalorder %s4025_s8, %s3904_s26  ;;  %p3910_p1 = scmp.lt.s32.totalorder %s3904_s26, %s3904_s26 }
  0x3f   :  { %p3911_p2 = por %p3910_p1, %p3909_p0 }
  0x41   :  { %p3912_p3 = pnand %p3911_p2, %p3905_p13 }
  0x43   :  { %3915 = shalt.err (!%p3912_p3)
}
  0x44   :  { %67 = dma.hbm_to_vmem [thread:$0]  %s4630_s5, 1024, %s4025_s8, [#allocation9], %s3950_s1, %s3950_s1, %s3951_s25  }
  0x45   :  { %3938 = dma.done.wait [#allocation3], 2048  }
  0x46   :  { %3939 = vsyncadd [#allocation3], 4294965248 }
  0x47   :  { %3940 = dma.done.wait [#allocation6], 17536  }
  0x48   :  { %3941 = vsyncadd [#allocation6], 4294949760 }
  0x49   :  { %3942 = dma.done.wait [#allocation9], 1024  }
  0x4a   :  { %3943 = vsyncadd [#allocation9], 4294966272  ;;  %v3954_v0 = vmov 0   ;;  %v4064_v1 = vld [vmem:[#allocation5 + $0x4] ss:$8 sps:$4 sm:$0xff]   ;;  %vm154_vm0 = vcmask 1043456   ;;  %v94_v63 = vlaneseq }
  0x4b   :  { %193 = vmatprep.mubr.bf16.mxu0 %v3954_v0  ;;  %239 = vmatprep.mubr.bf16.mxu1 %v3954_v0  ;;  %v4066_v2 = vld [vmem:[#allocation5] ss:$8 sps:$4 sm:$0xff]   ;;  %v4070_v3 = vld [vmem:[#allocation5 + $0x14] ss:$8 sps:$4 sm:$0xff]   ;;  %v4074_v4 = vld [vmem:[#allocation5 + $0x10] ss:$8 sps:$4 sm:$0xff]  }
  0x4c   :  { %161 = vmatprep.subr.bf16.mxu0 %v4064_v1  ;;  %207 = vmatprep.subr.bf16.mxu1 %v4064_v1  ;;  %v4078_v5 = vld [vmem:[#allocation5 + $0x24] ss:$8 sps:$4 sm:$0xff]   ;;  %v4082_v8 = vld [vmem:[#allocation5 + $0x20] ss:$8 sps:$4 sm:$0xff]   ;;  %v4086_v9 = vld [vmem:[#allocation5 + $0x34] ss:$8 sps:$4 sm:$0xff]  }
  0x4d   :  { %162 = vmatpush1.bf16.msra.mxu0 %v4066_v2  ;;  %208 = vmatpush1.bf16.msra.mxu1 %v4066_v2  ;;  %v91_v6 = vld [vmem:[#allocation5 + $0x40] sm:$0xff]  ;;  %v4091_v11 = vld [vmem:[#allocation5 + $0x30] ss:$8 sps:$4 sm:$0xff]   ;;  %vm150_vm1 = vcmask 588800   ;;  %v3672_v21 = vld [vmem:[#allocation7 + $0x40] sm:$0xff]   ;;  %vm3956_vm2 = vmmov 0  }
  0x4e   :  { %163 = vmatprep.subr.bf16.mxu0 %v4070_v3  ;;  %209 = vmatprep.subr.bf16.mxu1 %v4070_v3  ;;  %v3237_v7 = vcombine.low %v91_v6, %v91_v6  ;;  %v4097_v12 = vcombine.high %v91_v6, %v91_v6  ;;  %v104_v13 = vld [vmem:[#allocation2] sm:$0xf]  ;;  %v385_v17 = vld [vmem:[#allocation2 + $0x4] sm:$0xf]  ;;  %v3673_v22 = vld [vmem:[#allocation7] sm:$0xff]   ;;  %v95_v6 = vshrl.u32 %v94_v63, 7 }
  0x4f   :  { %v203_v14 = vld [vmem:[#allocation2 + $0x20] sm:$0xf]  ;;  %v431_v18 = vld [vmem:[#allocation2 + $0x24] sm:$0xf]  ;;  %v3674_v23 = vld [vmem:[#allocation7 + $0x48] sm:$0xff]  }
  0x50   :  { %v4089_v10 = vsel %vm154_vm0, %v3237_v7, 0  ;;  %v251_v15 = vld [vmem:[#allocation2 + $0x40] sm:$0xf]  ;;  %v479_v19 = vld [vmem:[#allocation2 + $0x44] sm:$0xf]  ;;  %v3675_v24 = vld [vmem:[#allocation7 + $0x8] sm:$0xff]  }
  0x51   :  { %164 = vmatpush1.bf16.msra.mxu0 %v4074_v4  ;;  %210 = vmatpush1.bf16.msra.mxu1 %v4074_v4  ;;  %v299_v16 = vld [vmem:[#allocation2 + $0x60] sm:$0xf]  ;;  %v527_v20 = vld [vmem:[#allocation2 + $0x64] sm:$0xf]  ;;  %v3676_v25 = vld [vmem:[#allocation7 + $0x50] sm:$0xff]   ;;  %v96_v7 = vsub.s32 0, %v95_v6 }
  0x52   :  { %165 = vmatprep.subr.bf16.mxu0 %v4078_v5  ;;  %211 = vmatprep.subr.bf16.mxu1 %v4078_v5  ;;  %v3677_v26 = vld [vmem:[#allocation7 + $0x10] sm:$0xff]   ;;  %v3678_v27 = vld [vmem:[#allocation7 + $0x58] sm:$0xff]   ;;  %v3680_v29 = vld [vmem:[#allocation7 + $0x60] sm:$0xff]  }
  0x53   :  { %v3679_v28 = vld [vmem:[#allocation7 + $0x18] sm:$0xff]   ;;  %v3681_v30 = vld [vmem:[#allocation7 + $0x20] sm:$0xff]   ;;  %v3682_v31 = vld [vmem:[#allocation7 + $0x68] sm:$0xff]  }
  0x54   :  { %v3683_v32 = vld [vmem:[#allocation7 + $0x28] sm:$0xff]   ;;  %v3684_v33 = vld [vmem:[#allocation7 + $0x70] sm:$0xff]   ;;  %v3686_v35 = vld [vmem:[#allocation7 + $0x78] sm:$0xff]  }
  0x55   :  { %166 = vmatpush1.bf16.msra.mxu0 %v4082_v8  ;;  %212 = vmatpush1.bf16.msra.mxu1 %v4082_v8  ;;  %v3685_v34 = vld [vmem:[#allocation7 + $0x30] sm:$0xff]   ;;  %v3687_v36 = vld [vmem:[#allocation7 + $0x38] sm:$0xff]   ;;  %v3688_v37 = vld [vmem:[#allocation7 + $0xc0] sm:$0xff]  }
  0x56   :  { %167 = vmatprep.subr.bf16.mxu0 %v4086_v9  ;;  %213 = vmatprep.subr.bf16.mxu1 %v4086_v9  ;;  %v3689_v38 = vld [vmem:[#allocation7 + $0x80] sm:$0xff]   ;;  %v3690_v39 = vld [vmem:[#allocation7 + $0xc8] sm:$0xff]   ;;  %v3692_v41 = vld [vmem:[#allocation7 + $0xd0] sm:$0xff]  }
  0x57   :  { %v3691_v40 = vld [vmem:[#allocation7 + $0x88] sm:$0xff]   ;;  %v3693_v42 = vld [vmem:[#allocation7 + $0x90] sm:$0xff]   ;;  %v3694_v43 = vld [vmem:[#allocation7 + $0xd8] sm:$0xff]  }
  0x58   :  { %v3695_v44 = vld [vmem:[#allocation7 + $0x98] sm:$0xff]   ;;  %v3696_v45 = vld [vmem:[#allocation7 + $0xe0] sm:$0xff]   ;;  %v3698_v47 = vld [vmem:[#allocation7 + $0xe8] sm:$0xff]  }
  0x59   :  { %168 = vmatpush1.bf16.msra.mxu0 %v4091_v11  ;;  %214 = vmatpush1.bf16.msra.mxu1 %v4091_v11  ;;  %v3697_v46 = vld [vmem:[#allocation7 + $0xa0] sm:$0xff]   ;;  %v3699_v48 = vld [vmem:[#allocation7 + $0xa8] sm:$0xff]   ;;  %v3700_v49 = vld [vmem:[#allocation7 + $0xf0] sm:$0xff]  }
  0x5a   :  { %3239 = vmatprep.subr.msk.bf16.mxu0 %vm154_vm0, %v4097_v12  ;;  %3241 = vmatprep.subr.msk.bf16.mxu1 %vm154_vm0, %v4097_v12  ;;  %v3701_v50 = vld [vmem:[#allocation7 + $0xb0] sm:$0xff]   ;;  %v3702_v51 = vld [vmem:[#allocation7 + $0xf8] sm:$0xff]  }
  0x5b   :  { %v3703_v52 = vld [vmem:[#allocation7 + $0xb8] sm:$0xff]  }
  0x5c   :  { %v4245_v63 = vld [vmem:[#allocation5 + $0x24] ss:$8 sps:$4 sm:$0xff]  }
  0x5d   :  { %170 = vmatpush1.bf16.msra.mxu0 %v4089_v10  ;;  %216 = vmatpush1.bf16.msra.mxu1 %v4089_v10 }
  0x5e   :  { %255 = vmatprep.subr.bf16.mxu0 %v4064_v1  ;;  %303 = vmatprep.subr.bf16.mxu1 %v4064_v1 }
  0x60   :  { %3240 = vmatmul.mubr.msk.bf16.vlgmr.msra.gmra.mrb[0].mxu0 %vm150_vm1, %v104_v13  ;;  %3242 = vmatmul.mubr.msk.bf16.vlgmr.msra.gmra.mrb[0].mxu1 %vm150_vm1, %v203_v14  ;;  %v92_v13 = vld [vmem:[%s4627_s2] sm:$0x3]  ;;  %v100_v14 = vsub.s32 1, %v95_v6 }
  0x61   :  { %256 = vmatpush1.bf16.msra.mxu0 %v4066_v2  ;;  %304 = vmatpush1.bf16.msra.mxu1 %v4066_v2  ;;  %v4250_v6 = vld [vmem:[#allocation5 + $0x20] ss:$8 sps:$4 sm:$0xff]  }
  0x62   :  { %257 = vmatprep.subr.bf16.mxu0 %v4070_v3  ;;  %305 = vmatprep.subr.bf16.mxu1 %v4070_v3 }
  0x63   :  { %287 = vmatprep.mubr.bf16.mxu0 %v3954_v0  ;;  %335 = vmatprep.mubr.bf16.mxu1 %v3954_v0 }
  0x65   :  { %258 = vmatpush1.bf16.msra.mxu0 %v4074_v4  ;;  %306 = vmatpush1.bf16.msra.mxu1 %v4074_v4 }
  0x66   :  { %259 = vmatprep.subr.bf16.mxu0 %v4078_v5  ;;  %307 = vmatprep.subr.bf16.mxu1 %v4078_v5 }
  0x69   :  { %260 = vmatpush1.bf16.msra.mxu0 %v4082_v8  ;;  %308 = vmatpush1.bf16.msra.mxu1 %v4082_v8 }
  0x6a   :  { %261 = vmatprep.subr.bf16.mxu0 %v4086_v9  ;;  %309 = vmatprep.subr.bf16.mxu1 %v4086_v9 }
  0x6d   :  { %262 = vmatpush1.bf16.msra.mxu0 %v4091_v11  ;;  %310 = vmatpush1.bf16.msra.mxu1 %v4091_v11 }
  0x6e   :  { %3243 = vmatprep.subr.msk.bf16.mxu0 %vm154_vm0, %v4097_v12  ;;  %3245 = vmatprep.subr.msk.bf16.mxu1 %vm154_vm0, %v4097_v12 }
  0x71   :  { %264 = vmatpush1.bf16.msra.mxu0 %v4089_v10  ;;  %312 = vmatpush1.bf16.msra.mxu1 %v4089_v10 }
  0x72   :  { %389 = vmatprep.subr.bf16.mxu0 %v4064_v1  ;;  %435 = vmatprep.subr.bf16.mxu1 %v4064_v1 }
  0x74   :  { %3244 = vmatmul.mubr.msk.bf16.vlgmr.msra.gmra.mrb[4].mxu0 %vm150_vm1, %v251_v15  ;;  %3246 = vmatmul.mubr.msk.bf16.vlgmr.msra.gmra.mrb[4].mxu1 %vm150_vm1, %v299_v16 }
  0x75   :  { %390 = vmatpush1.bf16.msra.mxu0 %v4066_v2  ;;  %436 = vmatpush1.bf16.msra.mxu1 %v4066_v2 }
  0x76   :  { %391 = vmatprep.subr.bf16.mxu0 %v4070_v3  ;;  %437 = vmatprep.subr.bf16.mxu1 %v4070_v3 }
  0x77   :  { %421 = vmatprep.mubr.bf16.mxu0 %v3954_v0  ;;  %467 = vmatprep.mubr.bf16.mxu1 %v3954_v0 }
  0x79   :  { %392 = vmatpush1.bf16.msra.mxu0 %v4074_v4  ;;  %438 = vmatpush1.bf16.msra.mxu1 %v4074_v4 }
  0x7a   :  { %393 = vmatprep.subr.bf16.mxu0 %v4078_v5  ;;  %439 = vmatprep.subr.bf16.mxu1 %v4078_v5 }
  0x7d   :  { %394 = vmatpush1.bf16.msra.mxu0 %v4082_v8  ;;  %440 = vmatpush1.bf16.msra.mxu1 %v4082_v8 }
  0x7e   :  { %395 = vmatprep.subr.bf16.mxu0 %v4086_v9  ;;  %441 = vmatprep.subr.bf16.mxu1 %v4086_v9 }
  0x81   :  { %396 = vmatpush1.bf16.msra.mxu0 %v4091_v11  ;;  %442 = vmatpush1.bf16.msra.mxu1 %v4091_v11 }
  0x82   :  { %3247 = vmatprep.subr.msk.bf16.mxu0 %vm154_vm0, %v4097_v12  ;;  %3249 = vmatprep.subr.msk.bf16.mxu1 %vm154_vm0, %v4097_v12 }
  0x85   :  { %398 = vmatpush1.bf16.msra.mxu0 %v4089_v10  ;;  %444 = vmatpush1.bf16.msra.mxu1 %v4089_v10 }
  0x86   :  { %483 = vmatprep.subr.bf16.mxu0 %v4064_v1  ;;  %531 = vmatprep.subr.bf16.mxu1 %v4064_v1 }
  0x88   :  { %3248 = vmatmul.mubr.msk.bf16.vlgmr.msra.gmra.mrb[8].mxu0 %vm150_vm1, %v385_v17  ;;  %3250 = vmatmul.mubr.msk.bf16.vlgmr.msra.gmra.mrb[8].mxu1 %vm150_vm1, %v431_v18  ;;  %v4192_v17 = vrot.slane %v92_v13, %v96_v7  ;;  %v886_v7 = vld [vmem:[#allocation2 + $0x8] sm:$0xf] }
  0x89   :  { %484 = vmatpush1.bf16.msra.mxu0 %v4066_v2  ;;  %532 = vmatpush1.bf16.msra.mxu1 %v4066_v2 }
  0x8a   :  { %485 = vmatprep.subr.bf16.mxu0 %v4070_v3  ;;  %533 = vmatprep.subr.bf16.mxu1 %v4070_v3 }
  0x8b   :  { %515 = vmatprep.mubr.bf16.mxu0 %v3954_v0  ;;  %563 = vmatprep.mubr.bf16.mxu1 %v3954_v0 }
  0x8d   :  { %486 = vmatpush1.bf16.msra.mxu0 %v4074_v4  ;;  %534 = vmatpush1.bf16.msra.mxu1 %v4074_v4 }
  0x8e   :  { %487 = vmatprep.subr.bf16.mxu0 %v4078_v5  ;;  %535 = vmatprep.subr.bf16.mxu1 %v4078_v5 }
  0x91   :  { %488 = vmatpush1.bf16.msra.mxu0 %v4082_v8  ;;  %536 = vmatpush1.bf16.msra.mxu1 %v4082_v8 }
  0x92   :  { %489 = vmatprep.subr.bf16.mxu0 %v4086_v9  ;;  %537 = vmatprep.subr.bf16.mxu1 %v4086_v9 }
  0x95   :  { %490 = vmatpush1.bf16.msra.mxu0 %v4091_v11  ;;  %538 = vmatpush1.bf16.msra.mxu1 %v4091_v11 }
  0x96   :  { %3251 = vmatprep.subr.msk.bf16.mxu0 %vm154_vm0, %v4097_v12  ;;  %3253 = vmatprep.subr.msk.bf16.mxu1 %vm154_vm0, %v4097_v12 }
  0x99   :  { %492 = vmatpush1.bf16.msra.mxu0 %v4089_v10  ;;  %540 = vmatpush1.bf16.msra.mxu1 %v4089_v10 }
  0x9a   :  { %3463 = vmatprep.subr.bf16.mxu1 %v3672_v21  ;;  %3441 = vmatprep.subr.bf16.mxu0 %v3688_v37  ;;  %v4194_v21 = vrot.slane %v92_v13, %v100_v14  ;;  %v980_v13 = vld [vmem:[#allocation2 + $0x48] sm:$0xf]  ;;  %v1252_v14 = vld [vmem:[#allocation2 + $0xc] sm:$0xf] }
  0x9c   :  { %3252 = vmatmul.mubr.msk.bf16.vlgmr.msra.gmra.mrb[12].mxu0 %vm150_vm1, %v479_v19  ;;  %3254 = vmatmul.mubr.msk.bf16.vlgmr.msra.gmra.mrb[12].mxu1 %vm150_vm1, %v527_v20 }
  0x9d   :  { %3464 = vmatpush3.bf16.msra.mxu1 %v3673_v22  ;;  %3442 = vmatpush3.bf16.msra.mxu0 %v3689_v38 }
  0x9e   :  { %3465 = vmatprep.subr.bf16.mxu1 %v3674_v23  ;;  %3443 = vmatprep.subr.bf16.mxu0 %v3690_v39 }
  0xa1   :  { %3466 = vmatpush3.bf16.msra.mxu1 %v3675_v24  ;;  %3444 = vmatpush3.bf16.msra.mxu0 %v3691_v40 }
  0xa2   :  { %3467 = vmatprep.subr.bf16.mxu1 %v3676_v25  ;;  %3445 = vmatprep.subr.bf16.mxu0 %v3692_v41 }
  0xa5   :  { %3468 = vmatpush3.bf16.msra.mxu1 %v3677_v26  ;;  %3446 = vmatpush3.bf16.msra.mxu0 %v3693_v42 }
  0xa6   :  { %3469 = vmatprep.subr.bf16.mxu1 %v3678_v27  ;;  %3447 = vmatprep.subr.bf16.mxu0 %v3694_v43  ;;  %v4213_v43 = vld [vmem:[#allocation5] ss:$8 sps:$4 sm:$0xff]  }
  0xa9   :  { %3470 = vmatpush3.bf16.msra.mxu1 %v3679_v28  ;;  %3448 = vmatpush3.bf16.msra.mxu0 %v3695_v44 }
  0xaa   :  { %3471 = vmatprep.subr.bf16.mxu1 %v3680_v29  ;;  %3449 = vmatprep.subr.bf16.mxu0 %v3696_v45 }
  0xad   :  { %3472 = vmatpush3.bf16.msra.mxu1 %v3681_v30  ;;  %3450 = vmatpush3.bf16.msra.mxu0 %v3697_v46 }
  0xae   :  { %3473 = vmatprep.subr.bf16.mxu1 %v3682_v31  ;;  %3451 = vmatprep.subr.bf16.mxu0 %v3698_v47 }
  0xb1   :  { %3474 = vmatpush3.bf16.msra.mxu1 %v3683_v32  ;;  %3452 = vmatpush3.bf16.msra.mxu0 %v3699_v48 }
  0xb2   :  { %3475 = vmatprep.subr.bf16.mxu1 %v3684_v33  ;;  %3453 = vmatprep.subr.bf16.mxu0 %v3700_v49 }
  0xb5   :  { %3476 = vmatpush3.bf16.msra.mxu1 %v3685_v34  ;;  %3454 = vmatpush3.bf16.msra.mxu0 %v3701_v50 }
  0xb6   :  { %3477 = vmatprep.subr.bf16.mxu1 %v3686_v35  ;;  %3455 = vmatprep.subr.bf16.mxu0 %v3702_v51 }
  0xb9   :  { %3478 = vmatpush3.bf16.msra.mxu1 %v3687_v36  ;;  %3456 = vmatpush3.bf16.msra.mxu0 %v3703_v52 }
  0xba   :  { %936 = vmatprep.subr.bf16.mxu1 %v4064_v1  ;;  %890 = vmatprep.subr.bf16.mxu0 %v4064_v1 }
 0x133   :  { %v195_v53 = vpop.f32.mrb[0].mxu0  ;;  %v241_v54 = vpop.f32.mrb[0].mxu1 }
 0x134   :  { %v248_v55 = vmax.f32 %v195_v53, %v241_v54  ;;  %v197_v56 = vpop.f32.mrb[1].mxu0  ;;  %v243_v57 = vpop.f32.mrb[1].mxu1 }
 0x135   :  { %v249_v58 = vmax.f32 %v197_v56, %v243_v57  ;;  %v199_v59 = vpop.f32.mrb[2].mxu0  ;;  %v245_v60 = vpop.f32.mrb[2].mxu1 }
 0x136   :  { %v200_v61 = vpop.f32.mrb[3].mxu0  ;;  %v246_v62 = vpop.f32.mrb[3].mxu1 }
 0x137   :  { %v1028_v61 = vld [vmem:[#allocation2 + $0x68] sm:$0xf] }
 0x147   :  { %v289_v15 = vpop.f32.mrb[4].mxu0  ;;  %v337_v1 = vpop.f32.mrb[4].mxu1 }
 0x148   :  { %v296_v16 = vmax.f32 %v248_v55, %v289_v15  ;;  %v291_v18 = vpop.f32.mrb[5].mxu0  ;;  %v339_v19 = vpop.f32.mrb[5].mxu1  ;;  %v4225_v55 = vld [vmem:[#allocation5 + $0x34] ss:$8 sps:$4 sm:$0xff]   ;;  %v3704_v15 = vld [vmem:[#allocation7 + $0x140] sm:$0xff]  }
 0x149   :  { %v297_v20 = vmax.f32 %v249_v58, %v291_v18  ;;  %v293_v22 = vpop.f32.mrb[6].mxu0  ;;  %v341_v23 = vpop.f32.mrb[6].mxu1  ;;  %v4230_v58 = vld [vmem:[#allocation5 + $0x30] ss:$8 sps:$4 sm:$0xff]  }
 0x14a   :  { %v344_v24 = vmax.f32 %v296_v16, %v337_v1  ;;  %v294_v25 = vpop.f32.mrb[7].mxu0  ;;  %v342_v26 = vpop.f32.mrb[7].mxu1  ;;  %v3705_v1 = vld [vmem:[#allocation7 + $0x100] sm:$0xff]   ;;  %v3706_v16 = vld [vmem:[#allocation7 + $0x148] sm:$0xff]   ;;  %v3709_v22 = vld [vmem:[#allocation7 + $0x110] sm:$0xff]  }
 0x14b   :  { %v345_v27 = vmax.f32 %v297_v20, %v339_v19  ;;  %v3707_v18 = vld [vmem:[#allocation7 + $0x108] sm:$0xff]   ;;  %v3708_v19 = vld [vmem:[#allocation7 + $0x150] sm:$0xff]   ;;  %v1298_v20 = vld [vmem:[#allocation2 + $0x2c] sm:$0xf] }
 0x14c   :  { %v346_v28 = vadd.f32 %v344_v24, %v4192_v17  ;;  %v3710_v23 = vld [vmem:[#allocation7 + $0x158] sm:$0xff]   ;;  %v3712_v25 = vld [vmem:[#allocation7 + $0x160] sm:$0xff]  }
 0x14d   :  { %v347_v29 = vadd.f32 %v345_v27, %v4194_v21  ;;  %v3711_v24 = vld [vmem:[#allocation7 + $0x118] sm:$0xff]   ;;  %v3713_v26 = vld [vmem:[#allocation7 + $0x120] sm:$0xff]   ;;  %v3714_v27 = vld [vmem:[#allocation7 + $0x168] sm:$0xff]  }
 0x14e   :  { %v348_v30 = vmax.f32 %v346_v28, 0.0  ;;  %v3715_v28 = vld [vmem:[#allocation7 + $0x128] sm:$0xff]  }
 0x14f   :  { %v349_v31 = vmax.f32 %v347_v29, 0.0  ;;  %v3716_v29 = vld [vmem:[#allocation7 + $0x170] sm:$0xff]  }
 0x150   :  { %v350_v33 = vpack.c.bf16 %v348_v30, %v348_v30  ;;  %v3717_v30 = vld [vmem:[#allocation7 + $0x130] sm:$0xff]  }
 0x151   :  { %v351_v32 = vpack.c.bf16 %v349_v31, %v349_v31  ;;  %v3718_v31 = vld [vmem:[#allocation7 + $0x178] sm:$0xff]  }
 0x153   :  { %877 = vmatprep.mubr.bf16.mxu1 %v351_v32  ;;  %v3719_v32 = vld [vmem:[#allocation7 + $0x138] sm:$0xff]  }
 0x154   :  { %878 = vmatmul.mubr.bf16.vlgmr.msra.gmra.mrb[16].mxu1 %v350_v33  ;;  %v1394_v33 = vld [vmem:[#allocation2 + $0x6c] sm:$0xf] }
 0x155   :  { %937 = vmatpush1.bf16.msra.mxu1 %v4066_v2  ;;  %968 = vmatprep.mubr.bf16.mxu1 %v3954_v0 }
 0x156   :  { %938 = vmatprep.subr.bf16.mxu1 %v4070_v3  ;;  %v932_v3 = vld [vmem:[#allocation2 + $0x28] sm:$0xf] }
 0x159   :  { %939 = vmatpush1.bf16.msra.mxu1 %v4074_v4  ;;  %v4209_v4 = vld [vmem:[#allocation5 + $0x4] ss:$8 sps:$4 sm:$0xff]  }
 0x15a   :  { %940 = vmatprep.subr.bf16.mxu1 %v4078_v5 }
 0x15b   :  { %v423_v34 = vpop.f32.mrb[8].mxu0  ;;  %v469_v35 = vpop.f32.mrb[8].mxu1 }
 0x15c   :  { %v476_v36 = vmax.f32 %v423_v34, %v469_v35  ;;  %v425_v37 = vpop.f32.mrb[9].mxu0  ;;  %v471_v38 = vpop.f32.mrb[9].mxu1 }
 0x15d   :  { %v477_v39 = vmax.f32 %v425_v37, %v471_v38  ;;  %v427_v40 = vpop.f32.mrb[10].mxu0  ;;  %v473_v41 = vpop.f32.mrb[10].mxu1  ;;  %941 = vmatpush1.bf16.msra.mxu1 %v4082_v8 }
 0x15e   :  { %v428_v42 = vpop.f32.mrb[11].mxu0  ;;  %v474_v2 = vpop.f32.mrb[11].mxu1  ;;  %942 = vmatprep.subr.bf16.mxu1 %v4086_v9  ;;  %v4217_v9 = vld [vmem:[#allocation5 + $0x14] ss:$8 sps:$4 sm:$0xff]  }
 0x15f   :  { %v1618_v42 = vld [vmem:[#allocation2 + $0x10] sm:$0xf] }
 0x161   :  { %943 = vmatpush1.bf16.msra.mxu1 %v4091_v11  ;;  %v4220_v11 = vld [vmem:[#allocation5 + $0x10] ss:$8 sps:$4 sm:$0xff]  }
 0x162   :  { %3289 = vmatprep.subr.msk.bf16.mxu1 %vm154_vm0, %v4097_v12 }
 0x165   :  { %945 = vmatpush1.bf16.msra.mxu1 %v4089_v10 }
 0x166   :  { %1032 = vmatprep.subr.bf16.mxu1 %v4209_v4 }
 0x168   :  { %3290 = vmatmul.mubr.msk.bf16.vlgmr.msra.gmra.mrb[20].mxu1 %vm150_vm1, %v932_v3 }
 0x169   :  { %1033 = vmatpush1.bf16.msra.mxu1 %v4213_v43  ;;  %1064 = vmatprep.mubr.bf16.mxu1 %v3954_v0 }
 0x16a   :  { %1034 = vmatprep.subr.bf16.mxu1 %v4217_v9 }
 0x16d   :  { %1035 = vmatpush1.bf16.msra.mxu1 %v4220_v11 }
 0x16e   :  { %1036 = vmatprep.subr.bf16.mxu1 %v4078_v5 }
 0x16f   :  { %v517_v44 = vpop.f32.mrb[12].mxu0  ;;  %v565_v45 = vpop.f32.mrb[12].mxu1 }
 0x170   :  { %v524_v46 = vmax.f32 %v476_v36, %v517_v44  ;;  %v519_v47 = vpop.f32.mrb[13].mxu0  ;;  %v567_v48 = vpop.f32.mrb[13].mxu1 }
 0x171   :  { %v525_v49 = vmax.f32 %v477_v39, %v519_v47  ;;  %v521_v50 = vpop.f32.mrb[14].mxu0  ;;  %v569_v51 = vpop.f32.mrb[14].mxu1  ;;  %1037 = vmatpush1.bf16.msra.mxu1 %v4082_v8 }
 0x172   :  { %v572_v52 = vmax.f32 %v524_v46, %v565_v45  ;;  %v522_v53 = vpop.f32.mrb[15].mxu0  ;;  %v570_v54 = vpop.f32.mrb[15].mxu1  ;;  %1038 = vmatprep.subr.bf16.mxu1 %v4225_v55 }
 0x173   :  { %v573_v56 = vmax.f32 %v525_v49, %v567_v48 }
 0x174   :  { %v574_v5 = vadd.f32 %v572_v52, %v4192_v17 }
 0x175   :  { %v575_v57 = vadd.f32 %v573_v56, %v4194_v21  ;;  %1039 = vmatpush1.bf16.msra.mxu1 %v4230_v58 }
 0x176   :  { %v576_v59 = vmax.f32 %v574_v5, 0.0  ;;  %3293 = vmatprep.subr.msk.bf16.mxu1 %vm154_vm0, %v4097_v12 }
 0x177   :  { %v577_v8 = vmax.f32 %v575_v57, 0.0 }
 0x178   :  { %v578_v62 = vpack.c.bf16 %v576_v59, %v576_v59 }
 0x179   :  { %v579_v60 = vpack.c.bf16 %v577_v8, %v577_v8  ;;  %1041 = vmatpush1.bf16.msra.mxu1 %v4089_v10 }
 0x17a   :  { %1256 = vmatprep.subr.bf16.mxu1 %v4209_v4 }
 0x17b   :  { %741 = vmatprep.mubr.bf16.mxu0 %v579_v60 }
 0x17c   :  { %742 = vmatmul.mubr.bf16.vlgmr.msra.gmra.mrb[16].mxu0 %v578_v62  ;;  %3294 = vmatmul.mubr.msk.bf16.vlgmr.msra.gmra.mrb[24].mxu1 %vm150_vm1, %v1028_v61 }
 0x17d   :  { %891 = vmatpush1.bf16.msra.mxu0 %v4213_v43  ;;  %922 = vmatprep.mubr.bf16.mxu0 %v3954_v0 }
 0x17e   :  { %892 = vmatprep.subr.bf16.mxu0 %v4217_v9  ;;  %1257 = vmatpush1.bf16.msra.mxu1 %v4213_v43 }
 0x17f   :  { %1258 = vmatprep.subr.bf16.mxu1 %v4217_v9  ;;  %1288 = vmatprep.mubr.bf16.mxu1 %v3954_v0 }
 0x181   :  { %893 = vmatpush1.bf16.msra.mxu0 %v4220_v11 }
 0x182   :  { %894 = vmatprep.subr.bf16.mxu0 %v4245_v63  ;;  %1259 = vmatpush1.bf16.msra.mxu1 %v4220_v11 }
 0x183   :  { %1260 = vmatprep.subr.bf16.mxu1 %v4245_v63 }
 0x185   :  { %895 = vmatpush1.bf16.msra.mxu0 %v4250_v6 }
 0x186   :  { %896 = vmatprep.subr.bf16.mxu0 %v4225_v55  ;;  %1261 = vmatpush1.bf16.msra.mxu1 %v4250_v6 }
 0x187   :  { %1262 = vmatprep.subr.bf16.mxu1 %v4225_v55 }
 0x189   :  { %897 = vmatpush1.bf16.msra.mxu0 %v4230_v58 }
 0x18a   :  { %3287 = vmatprep.subr.msk.bf16.mxu0 %vm154_vm0, %v4097_v12  ;;  %1263 = vmatpush1.bf16.msra.mxu1 %v4230_v58 }
 0x18b   :  { %3311 = vmatprep.subr.msk.bf16.mxu1 %vm154_vm0, %v4097_v12 }
 0x18d   :  { %899 = vmatpush1.bf16.msra.mxu0 %v4089_v10 }
 0x18e   :  { %984 = vmatprep.subr.bf16.mxu0 %v4209_v4  ;;  %1265 = vmatpush1.bf16.msra.mxu1 %v4089_v10 }
 0x18f   :  { %1302 = vmatprep.subr.bf16.mxu1 %v4209_v4 }
 0x190   :  { %3288 = vmatmul.mubr.msk.bf16.vlgmr.msra.gmra.mrb[20].mxu0 %vm150_vm1, %v886_v7 }
 0x191   :  { %985 = vmatpush1.bf16.msra.mxu0 %v4213_v43  ;;  %1016 = vmatprep.mubr.bf16.mxu0 %v3954_v0 }
 0x192   :  { %986 = vmatprep.subr.bf16.mxu0 %v4217_v9  ;;  %3312 = vmatmul.mubr.msk.bf16.vlgmr.msra.gmra.mrb[28].mxu1 %vm150_vm1, %v1252_v14 }
 0x193   :  { %1303 = vmatpush1.bf16.msra.mxu1 %v4213_v43  ;;  %1334 = vmatprep.mubr.bf16.mxu1 %v3954_v0 }
 0x194   :  { %1304 = vmatprep.subr.bf16.mxu1 %v4217_v9 }
 0x195   :  { %987 = vmatpush1.bf16.msra.mxu0 %v4220_v11 }
 0x196   :  { %988 = vmatprep.subr.bf16.mxu0 %v4245_v63 }
 0x197   :  { %1305 = vmatpush1.bf16.msra.mxu1 %v4220_v11 }
 0x198   :  { %1306 = vmatprep.subr.bf16.mxu1 %v4245_v63 }
 0x199   :  { %989 = vmatpush1.bf16.msra.mxu0 %v4250_v6 }
 0x19a   :  { %990 = vmatprep.subr.bf16.mxu0 %v4225_v55 }
 0x19b   :  { %1307 = vmatpush1.bf16.msra.mxu1 %v4250_v6 }
 0x19c   :  { %1308 = vmatprep.subr.bf16.mxu1 %v4225_v55 }
 0x19d   :  { %991 = vmatpush1.bf16.msra.mxu0 %v4230_v58 }
 0x19e   :  { %3291 = vmatprep.subr.msk.bf16.mxu0 %vm154_vm0, %v4097_v12 }
 0x19f   :  { %1309 = vmatpush1.bf16.msra.mxu1 %v4230_v58 }
 0x1a0   :  { %3313 = vmatprep.subr.msk.bf16.mxu1 %vm154_vm0, %v4097_v12 }
 0x1a1   :  { %993 = vmatpush1.bf16.msra.mxu0 %v4089_v10 }
 0x1a2   :  { %3485 = vmatprep.subr.bf16.mxu0 %v3704_v15 }
 0x1a3   :  { %1311 = vmatpush1.bf16.msra.mxu1 %v4089_v10 }
 0x1a4   :  { %3292 = vmatmul.mubr.msk.bf16.vlgmr.msra.gmra.mrb[24].mxu0 %vm150_vm1, %v980_v13  ;;  %1398 = vmatprep.subr.bf16.mxu1 %v4209_v4 }
 0x1a5   :  { %3486 = vmatpush3.bf16.msra.mxu0 %v3705_v1 }
 0x1a6   :  { %3487 = vmatprep.subr.bf16.mxu0 %v3706_v16  ;;  %3314 = vmatmul.mubr.msk.bf16.vlgmr.msra.gmra.mrb[32].mxu1 %vm150_vm1, %v1298_v20 }
 0x1a7   :  { %1399 = vmatpush1.bf16.msra.mxu1 %v4213_v43  ;;  %1430 = vmatprep.mubr.bf16.mxu1 %v3954_v0 }
 0x1a8   :  { %1400 = vmatprep.subr.bf16.mxu1 %v4217_v9 }
 0x1a9   :  { %3488 = vmatpush3.bf16.msra.mxu0 %v3707_v18 }
 0x1aa   :  { %3489 = vmatprep.subr.bf16.mxu0 %v3708_v19 }
 0x1ab   :  { %1401 = vmatpush1.bf16.msra.mxu1 %v4220_v11 }
 0x1ac   :  { %1402 = vmatprep.subr.bf16.mxu1 %v4245_v63 }
 0x1ad   :  { %3490 = vmatpush3.bf16.msra.mxu0 %v3709_v22 }
 0x1ae   :  { %3491 = vmatprep.subr.bf16.mxu0 %v3710_v23  ;;  %v3720_v23 = vld [vmem:[#allocation7 + $0x1c0] sm:$0xff]  }
 0x1af   :  { %1403 = vmatpush1.bf16.msra.mxu1 %v4250_v6 }
 0x1b0   :  { %1404 = vmatprep.subr.bf16.mxu1 %v4225_v55 }
 0x1b1   :  { %3492 = vmatpush3.bf16.msra.mxu0 %v3711_v24  ;;  %v1346_v24 = vld [vmem:[#allocation2 + $0x4c] sm:$0xf] }
 0x1b2   :  { %3493 = vmatprep.subr.bf16.mxu0 %v3712_v25 }
 0x1b3   :  { %1405 = vmatpush1.bf16.msra.mxu1 %v4230_v58 }
 0x1b4   :  { %3317 = vmatprep.subr.msk.bf16.mxu1 %vm154_vm0, %v4097_v12 }
 0x1b5   :  { %3494 = vmatpush3.bf16.msra.mxu0 %v3713_v26 }
 0x1b6   :  { %3495 = vmatprep.subr.bf16.mxu0 %v3714_v27 }
 0x1b7   :  { %1407 = vmatpush1.bf16.msra.mxu1 %v4089_v10 }
 0x1b8   :  { %1622 = vmatprep.subr.bf16.mxu1 %v4209_v4 }
 0x1b9   :  { %3496 = vmatpush3.bf16.msra.mxu0 %v3715_v28 }
 0x1ba   :  { %3497 = vmatprep.subr.bf16.mxu0 %v3716_v29  ;;  %3318 = vmatmul.mubr.msk.bf16.vlgmr.msra.gmra.mrb[36].mxu1 %vm150_vm1, %v1394_v33 }
 0x1bb   :  { %1623 = vmatpush1.bf16.msra.mxu1 %v4213_v43  ;;  %1654 = vmatprep.mubr.bf16.mxu1 %v3954_v0 }
 0x1bc   :  { %1624 = vmatprep.subr.bf16.mxu1 %v4217_v9 }
 0x1bd   :  { %3498 = vmatpush3.bf16.msra.mxu0 %v3717_v30 }
 0x1be   :  { %3499 = vmatprep.subr.bf16.mxu0 %v3718_v31 }
 0x1bf   :  { %1625 = vmatpush1.bf16.msra.mxu1 %v4220_v11 }
 0x1c0   :  { %1626 = vmatprep.subr.bf16.mxu1 %v4245_v63 }
 0x1c1   :  { %3500 = vmatpush3.bf16.msra.mxu0 %v3719_v32 }
 0x1c2   :  { %1350 = vmatprep.subr.bf16.mxu0 %v4209_v4 }
 0x1c3   :  { %1627 = vmatpush1.bf16.msra.mxu1 %v4250_v6 }
 0x1c4   :  { %1628 = vmatprep.subr.bf16.mxu1 %v4225_v55 }
 0x1c7   :  { %1629 = vmatpush1.bf16.msra.mxu1 %v4230_v58 }
 0x1c8   :  { %3335 = vmatprep.subr.msk.bf16.mxu1 %vm154_vm0, %v4097_v12 }
 0x1cb   :  { %1631 = vmatpush1.bf16.msra.mxu1 %v4089_v10 }
 0x1cc   :  { %1668 = vmatprep.subr.bf16.mxu1 %v4209_v4 }
 0x1ce   :  { %3336 = vmatmul.mubr.msk.bf16.vlgmr.msra.gmra.mrb[40].mxu1 %vm150_vm1, %v1618_v42  ;;  %v3727_v42 = vld [vmem:[#allocation7 + $0x198] sm:$0xff]  }
 0x1cf   :  { %1669 = vmatpush1.bf16.msra.mxu1 %v4213_v43  ;;  %1700 = vmatprep.mubr.bf16.mxu1 %v3954_v0 }
 0x1d0   :  { %1670 = vmatprep.subr.bf16.mxu1 %v4217_v9 }
 0x1d3   :  { %1671 = vmatpush1.bf16.msra.mxu1 %v4220_v11 }
 0x1d4   :  { %1672 = vmatprep.subr.bf16.mxu1 %v4245_v63 }
 0x1d7   :  { %1673 = vmatpush1.bf16.msra.mxu1 %v4250_v6 }
 0x1d8   :  { %1674 = vmatprep.subr.bf16.mxu1 %v4225_v55 }
 0x1db   :  { %1675 = vmatpush1.bf16.msra.mxu1 %v4230_v58 }
 0x1dc   :  { %3337 = vmatprep.subr.msk.bf16.mxu1 %vm154_vm0, %v4097_v12 }
 0x1df   :  { %1677 = vmatpush1.bf16.msra.mxu1 %v4089_v10 }
 0x1e0   :  { %1764 = vmatprep.subr.bf16.mxu1 %v4209_v4 }
 0x227   :  { %v3479_v34 = vpop.f32.mrb[16].mxu1 }
 0x228   :  { %v3480_v35 = vpop.f32.mrb[17].mxu1 }
 0x229   :  { %v3481_v36 = vadd.f32 %v3480_v35, %v3479_v34  ;;  %v3482_v37 = vpop.f32.mrb[18].mxu1  ;;  %v3721_v35 = vld [vmem:[#allocation7 + $0x180] sm:$0xff]  }
 0x22a   :  { %v3483_v38 = vpop.f32.mrb[19].mxu1  ;;  %v3723_v37 = vld [vmem:[#allocation7 + $0x188] sm:$0xff]  }
 0x22b   :  { %v3724_v38 = vld [vmem:[#allocation7 + $0x1d0] sm:$0xff]  }
 0x23b   :  { %v970_v39 = vpop.f32.mrb[20].mxu1 }
 0x23c   :  { %v972_v40 = vpop.f32.mrb[21].mxu1 }
 0x23d   :  { %v974_v41 = vpop.f32.mrb[22].mxu1 }
 0x23e   :  { %v975_v2 = vpop.f32.mrb[23].mxu1  ;;  %v3726_v41 = vld [vmem:[#allocation7 + $0x1d8] sm:$0xff]  }
 0x23f   :  { %v3728_v2 = vld [vmem:[#allocation7 + $0x1e0] sm:$0xff]  }
 0x24f   :  { %v3457_v3 = vpop.f32.mrb[16].mxu0  ;;  %v1066_v44 = vpop.f32.mrb[24].mxu1 }
 0x250   :  { %v3458_v45 = vpop.f32.mrb[17].mxu0  ;;  %v1068_v46 = vpop.f32.mrb[25].mxu1 }
 0x251   :  { %v3459_v47 = vadd.f32 %v3458_v45, %v3457_v3  ;;  %v3460_v48 = vpop.f32.mrb[18].mxu0  ;;  %v1070_v49 = vpop.f32.mrb[26].mxu1  ;;  %v3729_v3 = vld [vmem:[#allocation7 + $0x1a0] sm:$0xff]   ;;  %v3730_v45 = vld [vmem:[#allocation7 + $0x1e8] sm:$0xff]  }
 0x252   :  { %v3461_v50 = vpop.f32.mrb[19].mxu0  ;;  %v1071_v51 = vpop.f32.mrb[27].mxu1 }
 0x253   :  { %v4332_v52 = vadd.f32 %v3481_v36, %v3459_v47  ;;  %v3722_v36 = vld [vmem:[#allocation7 + $0x1c8] sm:$0xff]   ;;  %v3732_v50 = vld [vmem:[#allocation7 + $0x1f0] sm:$0xff]  }
 0x254   :  { %v3733_v51 = vld [vmem:[#allocation7 + $0x1b0] sm:$0xff]  }
 0x263   :  { %v924_v53 = vpop.f32.mrb[20].mxu0 }
 0x264   :  { %v977_v54 = vmax.f32 %v924_v53, %v970_v39  ;;  %v926_v56 = vpop.f32.mrb[21].mxu0  ;;  %v3725_v39 = vld [vmem:[#allocation7 + $0x190] sm:$0xff]   ;;  %v3734_v53 = vld [vmem:[#allocation7 + $0x1f8] sm:$0xff]  }
 0x265   :  { %v978_v5 = vmax.f32 %v926_v56, %v972_v40  ;;  %v928_v57 = vpop.f32.mrb[22].mxu0  ;;  %v4348_v25 = vpop.f32.mrb[28].mxu1  ;;  %v1664_v40 = vld [vmem:[#allocation2 + $0x30] sm:$0xf] }
 0x266   :  { %v929_v59 = vpop.f32.mrb[23].mxu0  ;;  %v4350_v26 = vpop.f32.mrb[29].mxu1  ;;  %3338 = vmatmul.mubr.msk.bf16.vlgmr.msra.gmra.mrb[44].mxu1 %vm150_vm1, %v1664_v40  ;;  %v1760_v56 = vld [vmem:[#allocation2 + $0x70] sm:$0xf]  ;;  %v3740_v40 = vld [vmem:[#allocation7 + $0x250] sm:$0xff]  }
 0x267   :  { %v1294_v27 = vpop.f32.mrb[30].mxu1  ;;  %1765 = vmatpush1.bf16.msra.mxu1 %v4213_v43  ;;  %1796 = vmatprep.mubr.bf16.mxu1 %v3954_v0 }
 0x268   :  { %v1295_v28 = vpop.f32.mrb[31].mxu1  ;;  %1766 = vmatprep.subr.bf16.mxu1 %v4217_v9 }
 0x26b   :  { %1767 = vmatpush1.bf16.msra.mxu1 %v4220_v11 }
 0x26c   :  { %1768 = vmatprep.subr.bf16.mxu1 %v4245_v63 }
 0x26f   :  { %1769 = vmatpush1.bf16.msra.mxu1 %v4250_v6 }
 0x270   :  { %1770 = vmatprep.subr.bf16.mxu1 %v4225_v55 }
 0x273   :  { %1771 = vmatpush1.bf16.msra.mxu1 %v4230_v58 }
 0x274   :  { %3341 = vmatprep.subr.msk.bf16.mxu1 %vm154_vm0, %v4097_v12 }
 0x277   :  { %v1018_v8 = vpop.f32.mrb[24].mxu0  ;;  %1773 = vmatpush1.bf16.msra.mxu1 %v4089_v10 }
 0x278   :  { %v1025_v60 = vmax.f32 %v977_v54, %v1018_v8  ;;  %v1020_v61 = vpop.f32.mrb[25].mxu0  ;;  %1988 = vmatprep.subr.bf16.mxu1 %v4209_v4  ;;  %v3735_v54 = vld [vmem:[#allocation7 + $0x1b8] sm:$0xff]  }
 0x279   :  { %v1026_v62 = vmax.f32 %v978_v5, %v1020_v61  ;;  %v1022_v7 = vpop.f32.mrb[26].mxu0  ;;  %v4352_v29 = vpop.f32.mrb[32].mxu1 }
 0x27a   :  { %v1073_v13 = vmax.f32 %v1025_v60, %v1066_v44  ;;  %v1023_v14 = vpop.f32.mrb[27].mxu0  ;;  %v1343_v30 = vmax.f32 %v4348_v25, %v4352_v29  ;;  %v4356_v31 = vpop.f32.mrb[33].mxu1  ;;  %3342 = vmatmul.mubr.msk.bf16.vlgmr.msra.gmra.mrb[48].mxu1 %vm150_vm1, %v1760_v56  ;;  %v3736_v25 = vld [vmem:[#allocation7 + $0x240] sm:$0xff]   ;;  %v3751_v56 = vld [vmem:[#allocation7 + $0x238] sm:$0xff]  }
 0x27b   :  { %v1074_v15 = vmax.f32 %v1026_v62, %v1068_v46  ;;  %v1344_v32 = vmax.f32 %v4350_v26, %v4356_v31  ;;  %v1340_v33 = vpop.f32.mrb[34].mxu1  ;;  %v3731_v46 = vld [vmem:[#allocation7 + $0x1a8] sm:$0xff]   ;;  %1989 = vmatpush1.bf16.msra.mxu1 %v4213_v43  ;;  %2020 = vmatprep.mubr.bf16.mxu1 %v3954_v0 }
 0x27c   :  { %v1075_v1 = vadd.f32 %v1073_v13, %v4192_v17  ;;  %v1341_v34 = vpop.f32.mrb[35].mxu1  ;;  %1990 = vmatprep.subr.bf16.mxu1 %v4217_v9  ;;  %v1712_v26 = vld [vmem:[#allocation2 + $0x50] sm:$0xf] }
 0x27d   :  { %v1076_v16 = vadd.f32 %v1074_v15, %v4194_v21 }
 0x27e   :  { %v1077_v18 = vmax.f32 %v1075_v1, 0.0 }
 0x27f   :  { %v1078_v19 = vmax.f32 %v1076_v16, 0.0  ;;  %1991 = vmatpush1.bf16.msra.mxu1 %v4220_v11 }
 0x280   :  { %v1079_v22 = vpack.c.bf16 %v1077_v18, %v1077_v18  ;;  %1992 = vmatprep.subr.bf16.mxu1 %v4245_v63 }
 0x281   :  { %v1080_v20 = vpack.c.bf16 %v1078_v19, %v1078_v19 }
 0x283   :  { %1242 = vmatprep.mubr.bf16.mxu0 %v1080_v20  ;;  %1993 = vmatpush1.bf16.msra.mxu1 %v4250_v6 }
 0x284   :  { %1243 = vmatmul.mubr.bf16.vlgmr.msra.gmra.mrb[28].mxu0 %v1079_v22  ;;  %1994 = vmatprep.subr.bf16.mxu1 %v4225_v55 }
 0x285   :  { %1351 = vmatpush1.bf16.msra.mxu0 %v4213_v43  ;;  %1382 = vmatprep.mubr.bf16.mxu0 %v3954_v0 }
 0x286   :  { %1352 = vmatprep.subr.bf16.mxu0 %v4217_v9 }
 0x287   :  { %1995 = vmatpush1.bf16.msra.mxu1 %v4230_v58 }
 0x288   :  { %3359 = vmatprep.subr.msk.bf16.mxu1 %vm154_vm0, %v4097_v12 }
 0x289   :  { %1353 = vmatpush1.bf16.msra.mxu0 %v4220_v11 }
 0x28a   :  { %1354 = vmatprep.subr.bf16.mxu0 %v4245_v63 }
 0x28b   :  { %1997 = vmatpush1.bf16.msra.mxu1 %v4089_v10 }
 0x28c   :  { %2082 = vmatprep.subr.bf16.mxu1 %v4209_v4 }
 0x28d   :  { %1355 = vmatpush1.bf16.msra.mxu0 %v4250_v6  ;;  %v1432_v44 = vpop.f32.mrb[36].mxu1 }
 0x28e   :  { %1356 = vmatprep.subr.bf16.mxu0 %v4225_v55  ;;  %v1434_v47 = vpop.f32.mrb[37].mxu1 }
 0x28f   :  { %v1436_v48 = vpop.f32.mrb[38].mxu1 }
 0x290   :  { %v1437_v49 = vpop.f32.mrb[39].mxu1 }
 0x291   :  { %1357 = vmatpush1.bf16.msra.mxu0 %v4230_v58 }
 0x292   :  { %3315 = vmatprep.subr.msk.bf16.mxu0 %vm154_vm0, %v4097_v12 }
 0x295   :  { %1359 = vmatpush1.bf16.msra.mxu0 %v4089_v10 }
 0x296   :  { %3507 = vmatprep.subr.bf16.mxu0 %v3720_v23 }
 0x298   :  { %3316 = vmatmul.mubr.msk.bf16.vlgmr.msra.gmra.mrb[32].mxu0 %vm150_vm1, %v1346_v24 }
 0x299   :  { %3508 = vmatpush3.bf16.msra.mxu0 %v3721_v35 }
 0x29a   :  { %3509 = vmatprep.subr.bf16.mxu0 %v3722_v36 }
 0x29d   :  { %3510 = vmatpush3.bf16.msra.mxu0 %v3723_v37  ;;  %v3737_v37 = vld [vmem:[#allocation7 + $0x200] sm:$0xff]  }
 0x29e   :  { %3511 = vmatprep.subr.bf16.mxu0 %v3724_v38  ;;  %v3738_v38 = vld [vmem:[#allocation7 + $0x248] sm:$0xff]  }
 0x2a1   :  { %3512 = vmatpush3.bf16.msra.mxu0 %v3725_v39  ;;  %v4380_v5 = vpop.f32.mrb[40].mxu1  ;;  %v3739_v39 = vld [vmem:[#allocation7 + $0x208] sm:$0xff]  }
 0x2a2   :  { %3513 = vmatprep.subr.bf16.mxu0 %v3726_v41  ;;  %v4382_v57 = vpop.f32.mrb[41].mxu1  ;;  %v3741_v41 = vld [vmem:[#allocation7 + $0x210] sm:$0xff]  }
 0x2a3   :  { %v1660_v59 = vpop.f32.mrb[42].mxu1 }
 0x2a4   :  { %v1661_v8 = vpop.f32.mrb[43].mxu1 }
 0x2a5   :  { %3514 = vmatpush3.bf16.msra.mxu0 %v3727_v42  ;;  %v3742_v42 = vld [vmem:[#allocation7 + $0x258] sm:$0xff]  }
 0x2a6   :  { %3515 = vmatprep.subr.bf16.mxu0 %v3728_v2  ;;  %v3743_v2 = vld [vmem:[#allocation7 + $0x218] sm:$0xff]  }
 0x2a9   :  { %3516 = vmatpush3.bf16.msra.mxu0 %v3729_v3  ;;  %v3744_v3 = vld [vmem:[#allocation7 + $0x260] sm:$0xff]  }
 0x2aa   :  { %3517 = vmatprep.subr.bf16.mxu0 %v3730_v45 }
 0x2ad   :  { %3518 = vmatpush3.bf16.msra.mxu0 %v3731_v46  ;;  %v3746_v46 = vld [vmem:[#allocation7 + $0x268] sm:$0xff]  }
 0x2ae   :  { %3519 = vmatprep.subr.bf16.mxu0 %v3732_v50 }
 0x2b1   :  { %3520 = vmatpush3.bf16.msra.mxu0 %v3733_v51  ;;  %v3748_v51 = vld [vmem:[#allocation7 + $0x270] sm:$0xff]  }
 0x2b2   :  { %3521 = vmatprep.subr.bf16.mxu0 %v3734_v53  ;;  %v3749_v53 = vld [vmem:[#allocation7 + $0x230] sm:$0xff]  }
 0x2b5   :  { %3522 = vmatpush3.bf16.msra.mxu0 %v3735_v54  ;;  %v3750_v54 = vld [vmem:[#allocation7 + $0x278] sm:$0xff]  }
 0x2b6   :  { %1716 = vmatprep.subr.bf16.mxu0 %v4209_v4 }
 0x339   :  { %v4414_v29 = vpop.f32.mrb[44].mxu1 }
 0x33a   :  { %v4418_v31 = vpop.f32.mrb[45].mxu1 }
 0x33b   :  { %v1706_v35 = vpop.f32.mrb[46].mxu1 }
 0x33c   :  { %v1707_v36 = vpop.f32.mrb[47].mxu1  ;;  %v3754_v35 = vld [vmem:[#allocation7 + $0x2c8] sm:$0xff]  }
 0x33d   :  { %v3755_v36 = vld [vmem:[#allocation7 + $0x288] sm:$0xff]  }
 0x34d   :  { %v1798_v45 = vpop.f32.mrb[48].mxu1 }
 0x34e   :  { %v1800_v48 = vpop.f32.mrb[49].mxu1 }
 0x34f   :  { %v1802_v49 = vpop.f32.mrb[50].mxu1 }
 0x350   :  { %v1803_v50 = vpop.f32.mrb[51].mxu1  ;;  %v3765_v49 = vld [vmem:[#allocation7 + $0x2b0] sm:$0xff]  }
 0x351   :  { %v3766_v50 = vld [vmem:[#allocation7 + $0x2f8] sm:$0xff]  }
 0x357   :  { %v3501_v60 = vpop.f32.mrb[28].mxu0 }
 0x358   :  { %v3502_v61 = vpop.f32.mrb[29].mxu0 }
 0x359   :  { %v3503_v62 = vadd.f32 %v3502_v61, %v3501_v60  ;;  %v3504_v7 = vpop.f32.mrb[30].mxu0 }
 0x35a   :  { %v3505_v13 = vpop.f32.mrb[31].mxu0 }
 0x35b   :  { %v4392_v14 = vadd.f32 %v3503_v62, %v4332_v52 }
 0x36b   :  { %v1384_v15 = vpop.f32.mrb[32].mxu0 }
 0x36c   :  { %v1391_v1 = vmax.f32 %v1343_v30, %v1384_v15  ;;  %v1386_v16 = vpop.f32.mrb[33].mxu0  ;;  %v1709_v30 = vmax.f32 %v4380_v5, %v4414_v29  ;;  %v1984_v5 = vld [vmem:[#allocation2 + $0x14] sm:$0xf]  ;;  %v3753_v29 = vld [vmem:[#allocation7 + $0x280] sm:$0xff]  }
 0x36d   :  { %v1392_v18 = vmax.f32 %v1344_v32, %v1386_v16  ;;  %v1388_v19 = vpop.f32.mrb[34].mxu0  ;;  %v1710_v32 = vmax.f32 %v4382_v57, %v4418_v31  ;;  %3360 = vmatmul.mubr.msk.bf16.vlgmr.msra.gmra.mrb[52].mxu1 %vm150_vm1, %v1984_v5  ;;  %v2078_v57 = vld [vmem:[#allocation2 + $0x54] sm:$0xf] }
 0x36e   :  { %v1439_v20 = vmax.f32 %v1391_v1, %v1432_v44  ;;  %v1389_v22 = vpop.f32.mrb[35].mxu0  ;;  %v3745_v44 = vld [vmem:[#allocation7 + $0x220] sm:$0xff]   ;;  %2083 = vmatpush1.bf16.msra.mxu1 %v4213_v43  ;;  %2114 = vmatprep.mubr.bf16.mxu1 %v3954_v0 }
 0x36f   :  { %v1440_v23 = vmax.f32 %v1392_v18, %v1434_v47  ;;  %v3747_v47 = vld [vmem:[#allocation7 + $0x228] sm:$0xff]   ;;  %2084 = vmatprep.subr.bf16.mxu1 %v4217_v9 }
 0x370   :  { %v1441_v24 = vadd.f32 %v1439_v20, %v4192_v17 }
 0x371   :  { %v1442_v27 = vadd.f32 %v1440_v23, %v4194_v21 }
 0x372   :  { %v1443_v52 = vmax.f32 %v1441_v24, 0.0  ;;  %2085 = vmatpush1.bf16.msra.mxu1 %v4220_v11 }
 0x373   :  { %v1444_v28 = vmax.f32 %v1442_v27, 0.0  ;;  %2086 = vmatprep.subr.bf16.mxu1 %v4245_v63 }
 0x374   :  { %v1445_v34 = vpack.c.bf16 %v1443_v52, %v1443_v52 }
 0x375   :  { %v1446_v33 = vpack.c.bf16 %v1444_v28, %v1444_v28 }
 0x376   :  { %2087 = vmatpush1.bf16.msra.mxu1 %v4250_v6 }
 0x377   :  { %1608 = vmatprep.mubr.bf16.mxu0 %v1446_v33  ;;  %2088 = vmatprep.subr.bf16.mxu1 %v4225_v55 }
 0x378   :  { %1609 = vmatmul.mubr.bf16.vlgmr.msra.gmra.mrb[36].mxu0 %v1445_v34  ;;  %v2126_v34 = vld [vmem:[#allocation2 + $0x74] sm:$0xf] }
 0x379   :  { %1717 = vmatpush1.bf16.msra.mxu0 %v4213_v43  ;;  %1748 = vmatprep.mubr.bf16.mxu0 %v3954_v0 }
 0x37a   :  { %1718 = vmatprep.subr.bf16.mxu0 %v4217_v9  ;;  %2089 = vmatpush1.bf16.msra.mxu1 %v4230_v58 }
 0x37b   :  { %3363 = vmatprep.subr.msk.bf16.mxu1 %vm154_vm0, %v4097_v12 }
 0x37d   :  { %1719 = vmatpush1.bf16.msra.mxu0 %v4220_v11 }
 0x37e   :  { %1720 = vmatprep.subr.bf16.mxu0 %v4245_v63  ;;  %2091 = vmatpush1.bf16.msra.mxu1 %v4089_v10 }
 0x381   :  { %1721 = vmatpush1.bf16.msra.mxu0 %v4250_v6  ;;  %3364 = vmatmul.mubr.msk.bf16.vlgmr.msra.gmra.mrb[56].mxu1 %vm150_vm1, %v2078_v57 }
 0x382   :  { %1722 = vmatprep.subr.bf16.mxu0 %v4225_v55 }
 0x385   :  { %1723 = vmatpush1.bf16.msra.mxu0 %v4230_v58 }
 0x386   :  { %3339 = vmatprep.subr.msk.bf16.mxu0 %vm154_vm0, %v4097_v12 }
 0x389   :  { %1725 = vmatpush1.bf16.msra.mxu0 %v4089_v10 }
 0x38a   :  { %3529 = vmatprep.subr.bf16.mxu0 %v3736_v25 }
 0x38c   :  { %3340 = vmatmul.mubr.msk.bf16.vlgmr.msra.gmra.mrb[40].mxu0 %vm150_vm1, %v1712_v26  ;;  %v3752_v26 = vld [vmem:[#allocation7 + $0x2c0] sm:$0xff]  }
 0x38d   :  { %3530 = vmatpush3.bf16.msra.mxu0 %v3737_v37  ;;  %3551 = vmatprep.subr.bf16.mxu1 %v3752_v26  ;;  %v4521_v26 = vld [vmem:[#allocation5 + $0x4] ss:$8 sps:$4 sm:$0xff]  }
 0x38e   :  { %3531 = vmatprep.subr.bf16.mxu0 %v3738_v38  ;;  %3552 = vmatpush3.bf16.msra.mxu1 %v3753_v29  ;;  %v2492_v29 = vld [vmem:[#allocation2 + $0x78] sm:$0xf] }
 0x38f   :  { %3553 = vmatprep.subr.bf16.mxu1 %v3754_v35 }
 0x391   :  { %3532 = vmatpush3.bf16.msra.mxu0 %v3739_v39  ;;  %v3756_v39 = vld [vmem:[#allocation7 + $0x2d0] sm:$0xff]  }
 0x392   :  { %3533 = vmatprep.subr.bf16.mxu0 %v3740_v40  ;;  %3554 = vmatpush3.bf16.msra.mxu1 %v3755_v36  ;;  %v3757_v40 = vld [vmem:[#allocation7 + $0x290] sm:$0xff]   ;;  %v3770_v36 = vld [vmem:[#allocation7 + $0x348] sm:$0xff]  }
 0x393   :  { %3555 = vmatprep.subr.bf16.mxu1 %v3756_v39 }
 0x395   :  { %3534 = vmatpush3.bf16.msra.mxu0 %v3741_v41  ;;  %v3758_v41 = vld [vmem:[#allocation7 + $0x2d8] sm:$0xff]  }
 0x396   :  { %3535 = vmatprep.subr.bf16.mxu0 %v3742_v42  ;;  %3556 = vmatpush3.bf16.msra.mxu1 %v3757_v40  ;;  %v3772_v40 = vld [vmem:[#allocation7 + $0x350] sm:$0xff]  }
 0x397   :  { %3557 = vmatprep.subr.bf16.mxu1 %v3758_v41  ;;  %v3773_v41 = vld [vmem:[#allocation7 + $0x310] sm:$0xff]  }
 0x399   :  { %3536 = vmatpush3.bf16.msra.mxu0 %v3743_v2 }
 0x39a   :  { %3537 = vmatprep.subr.bf16.mxu0 %v3744_v3  ;;  %v3759_v3 = vld [vmem:[#allocation7 + $0x298] sm:$0xff]  }
 0x39b   :  { %3558 = vmatpush3.bf16.msra.mxu1 %v3759_v3 }
 0x39d   :  { %3538 = vmatpush3.bf16.msra.mxu0 %v3745_v44  ;;  %v3760_v44 = vld [vmem:[#allocation7 + $0x2e0] sm:$0xff]  }
 0x39e   :  { %3539 = vmatprep.subr.bf16.mxu0 %v3746_v46  ;;  %3559 = vmatprep.subr.bf16.mxu1 %v3760_v44  ;;  %v3762_v46 = vld [vmem:[#allocation7 + $0x2e8] sm:$0xff]   ;;  %v3775_v44 = vld [vmem:[#allocation7 + $0x318] sm:$0xff]  }
 0x3a1   :  { %3540 = vmatpush3.bf16.msra.mxu0 %v3747_v47  ;;  %v3763_v47 = vld [vmem:[#allocation7 + $0x2a8] sm:$0xff]  }
 0x3a2   :  { %3541 = vmatprep.subr.bf16.mxu0 %v3748_v51  ;;  %v3767_v51 = vld [vmem:[#allocation7 + $0x2b8] sm:$0xff]  }
 0x3a5   :  { %3542 = vmatpush3.bf16.msra.mxu0 %v3749_v53  ;;  %v2350_v53 = vld [vmem:[#allocation2 + $0x18] sm:$0xf] }
 0x3a6   :  { %3543 = vmatprep.subr.bf16.mxu0 %v3750_v54 }
 0x3a9   :  { %3544 = vmatpush3.bf16.msra.mxu0 %v3751_v56 }
 0x3aa   :  { %2034 = vmatprep.subr.bf16.mxu0 %v4209_v4 }
 0x440   :  { %v4479_v25 = vpop.f32.mrb[52].mxu1 }
 0x44b   :  { %v3523_v59 = vpop.f32.mrb[36].mxu0 }
 0x44c   :  { %v3524_v8 = vpop.f32.mrb[37].mxu0 }
 0x44d   :  { %v3525_v60 = vadd.f32 %v3524_v8, %v3523_v59  ;;  %v3526_v61 = vpop.f32.mrb[38].mxu0 }
 0x44e   :  { %v3527_v62 = vpop.f32.mrb[39].mxu0 }
 0x44f   :  { %v4437_v7 = vadd.f32 %v3525_v60, %v4392_v14  ;;  %v2030_v14 = vld [vmem:[#allocation2 + $0x34] sm:$0xf] }
 0x45f   :  { %v1750_v13 = vpop.f32.mrb[40].mxu0 }
 0x460   :  { %v1757_v15 = vmax.f32 %v1709_v30, %v1750_v13  ;;  %v1752_v1 = vpop.f32.mrb[41].mxu0  ;;  %v4481_v30 = vpop.f32.mrb[53].mxu1 }
 0x461   :  { %v1758_v16 = vmax.f32 %v1710_v32, %v1752_v1  ;;  %v1754_v18 = vpop.f32.mrb[42].mxu0  ;;  %v2026_v31 = vpop.f32.mrb[54].mxu1 }
 0x462   :  { %v1805_v19 = vmax.f32 %v1757_v15, %v1798_v45  ;;  %v1755_v20 = vpop.f32.mrb[43].mxu0  ;;  %v2027_v32 = vpop.f32.mrb[55].mxu1  ;;  %v3761_v45 = vld [vmem:[#allocation7 + $0x2a0] sm:$0xff]  }
 0x463   :  { %v1806_v22 = vmax.f32 %v1758_v16, %v1800_v48  ;;  %v2116_v37 = vpop.f32.mrb[56].mxu1  ;;  %3560 = vmatpush3.bf16.msra.mxu1 %v3761_v45  ;;  %v3764_v48 = vld [vmem:[#allocation7 + $0x2f0] sm:$0xff]   ;;  %v3768_v31 = vld [vmem:[#allocation7 + $0x340] sm:$0xff]  }
 0x464   :  { %v1807_v23 = vadd.f32 %v1805_v19, %v4192_v17  ;;  %v2118_v38 = vpop.f32.mrb[57].mxu1  ;;  %3561 = vmatprep.subr.bf16.mxu1 %v3762_v46  ;;  %v3769_v32 = vld [vmem:[#allocation7 + $0x300] sm:$0xff]  }
 0x465   :  { %v1808_v24 = vadd.f32 %v1806_v22, %v4194_v21  ;;  %v2120_v42 = vpop.f32.mrb[58].mxu1  ;;  %v3776_v45 = vld [vmem:[#allocation7 + $0x360] sm:$0xff]  }
 0x466   :  { %v1809_v27 = vmax.f32 %v1807_v23, 0.0  ;;  %v2121_v2 = vpop.f32.mrb[59].mxu1  ;;  %v3774_v42 = vld [vmem:[#allocation7 + $0x358] sm:$0xff]   ;;  %v3777_v46 = vld [vmem:[#allocation7 + $0x320] sm:$0xff]  }
 0x467   :  { %v1810_v52 = vmax.f32 %v1808_v24, 0.0  ;;  %3562 = vmatpush3.bf16.msra.mxu1 %v3763_v47  ;;  %v3778_v47 = vld [vmem:[#allocation7 + $0x368] sm:$0xff]  }
 0x468   :  { %v1811_v33 = vpack.c.bf16 %v1809_v27, %v1809_v27  ;;  %3563 = vmatprep.subr.bf16.mxu1 %v3764_v48  ;;  %v3779_v48 = vld [vmem:[#allocation7 + $0x328] sm:$0xff]  }
 0x469   :  { %v1812_v28 = vpack.c.bf16 %v1810_v52, %v1810_v52 }
 0x46b   :  { %1974 = vmatprep.mubr.bf16.mxu0 %v1812_v28  ;;  %3564 = vmatpush3.bf16.msra.mxu1 %v3765_v49  ;;  %v3780_v49 = vld [vmem:[#allocation7 + $0x370] sm:$0xff]  }
 0x46c   :  { %1975 = vmatmul.mubr.bf16.vlgmr.msra.gmra.mrb[44].mxu0 %v1811_v33  ;;  %3565 = vmatprep.subr.bf16.mxu1 %v3766_v50  ;;  %v4504_v33 = vld [vmem:[#allocation5] ss:$8 sps:$4 sm:$0xff]   ;;  %v3781_v50 = vld [vmem:[#allocation7 + $0x330] sm:$0xff]  }
 0x46d   :  { %2035 = vmatpush1.bf16.msra.mxu0 %v4213_v43  ;;  %2066 = vmatprep.mubr.bf16.mxu0 %v3954_v0 }
 0x46e   :  { %2036 = vmatprep.subr.bf16.mxu0 %v4217_v9 }
 0x46f   :  { %3566 = vmatpush3.bf16.msra.mxu1 %v3767_v51  ;;  %v3782_v51 = vld [vmem:[#allocation7 + $0x378] sm:$0xff]  }
 0x470   :  { %2400 = vmatprep.subr.bf16.mxu1 %v4209_v4 }
 0x471   :  { %2037 = vmatpush1.bf16.msra.mxu0 %v4220_v11 }
 0x472   :  { %2038 = vmatprep.subr.bf16.mxu0 %v4245_v63 }
 0x475   :  { %2039 = vmatpush1.bf16.msra.mxu0 %v4250_v6 }
 0x476   :  { %2040 = vmatprep.subr.bf16.mxu0 %v4225_v55 }
 0x479   :  { %2041 = vmatpush1.bf16.msra.mxu0 %v4230_v58 }
 0x47a   :  { %3361 = vmatprep.subr.msk.bf16.mxu0 %vm154_vm0, %v4097_v12 }
 0x47d   :  { %2043 = vmatpush1.bf16.msra.mxu0 %v4089_v10 }
 0x47e   :  { %2130 = vmatprep.subr.bf16.mxu0 %v4209_v4 }
 0x480   :  { %3362 = vmatmul.mubr.msk.bf16.vlgmr.msra.gmra.mrb[48].mxu0 %vm150_vm1, %v2030_v14  ;;  %v4508_v14 = vld [vmem:[#allocation5 + $0x14] ss:$8 sps:$4 sm:$0xff]  }
 0x481   :  { %2131 = vmatpush1.bf16.msra.mxu0 %v4213_v43  ;;  %2162 = vmatprep.mubr.bf16.mxu0 %v3954_v0 }
 0x482   :  { %2132 = vmatprep.subr.bf16.mxu0 %v4217_v9 }
 0x485   :  { %2133 = vmatpush1.bf16.msra.mxu0 %v4220_v11 }
 0x486   :  { %2134 = vmatprep.subr.bf16.mxu0 %v4245_v63 }
 0x489   :  { %2135 = vmatpush1.bf16.msra.mxu0 %v4250_v6 }
 0x48a   :  { %2136 = vmatprep.subr.bf16.mxu0 %v4225_v55 }
 0x48d   :  { %2137 = vmatpush1.bf16.msra.mxu0 %v4230_v58 }
 0x48e   :  { %3365 = vmatprep.subr.msk.bf16.mxu0 %vm154_vm0, %v4097_v12 }
 0x491   :  { %2139 = vmatpush1.bf16.msra.mxu0 %v4089_v10 }
 0x492   :  { %2354 = vmatprep.subr.bf16.mxu0 %v4209_v4 }
 0x494   :  { %3366 = vmatmul.mubr.msk.bf16.vlgmr.msra.gmra.mrb[52].mxu0 %vm150_vm1, %v2126_v34  ;;  %v4511_v34 = vld [vmem:[#allocation5 + $0x10] ss:$8 sps:$4 sm:$0xff]  }
 0x495   :  { %2355 = vmatpush1.bf16.msra.mxu0 %v4213_v43  ;;  %2386 = vmatprep.mubr.bf16.mxu0 %v3954_v0 }
 0x496   :  { %2356 = vmatprep.subr.bf16.mxu0 %v4217_v9 }
 0x499   :  { %2357 = vmatpush1.bf16.msra.mxu0 %v4220_v11 }
 0x49a   :  { %2358 = vmatprep.subr.bf16.mxu0 %v4245_v63 }
 0x49d   :  { %2359 = vmatpush1.bf16.msra.mxu0 %v4250_v6 }
 0x49e   :  { %2360 = vmatprep.subr.bf16.mxu0 %v4225_v55 }
 0x4a1   :  { %2361 = vmatpush1.bf16.msra.mxu0 %v4230_v58 }
 0x4a2   :  { %3383 = vmatprep.subr.msk.bf16.mxu0 %vm154_vm0, %v4097_v12 }
 0x4a5   :  { %2363 = vmatpush1.bf16.msra.mxu0 %v4089_v10 }
 0x4a6   :  { %2448 = vmatprep.subr.bf16.mxu0 %v4209_v4  ;;  %v2444_v4 = vld [vmem:[#allocation2 + $0x58] sm:$0xf] }
 0x4a8   :  { %3384 = vmatmul.mubr.msk.bf16.vlgmr.msra.gmra.mrb[56].mxu0 %vm150_vm1, %v2350_v53  ;;  %v3783_v53 = vld [vmem:[#allocation7 + $0x338] sm:$0xff]  }
 0x4a9   :  { %2449 = vmatpush1.bf16.msra.mxu0 %v4213_v43  ;;  %2480 = vmatprep.mubr.bf16.mxu0 %v3954_v0 }
 0x4aa   :  { %2450 = vmatprep.subr.bf16.mxu0 %v4217_v9 }
 0x4ad   :  { %2451 = vmatpush1.bf16.msra.mxu0 %v4220_v11 }
 0x4ae   :  { %2452 = vmatprep.subr.bf16.mxu0 %v4245_v63 }
 0x4b1   :  { %2453 = vmatpush1.bf16.msra.mxu0 %v4250_v6 }
 0x4b2   :  { %2454 = vmatprep.subr.bf16.mxu0 %v4225_v55 }
 0x4b5   :  { %2455 = vmatpush1.bf16.msra.mxu0 %v4230_v58 }
 0x4b6   :  { %3387 = vmatprep.subr.msk.bf16.mxu0 %vm154_vm0, %v4097_v12 }
 0x4b9   :  { %2457 = vmatpush1.bf16.msra.mxu0 %v4089_v10 }
 0x4ba   :  { %3573 = vmatprep.subr.bf16.mxu0 %v3768_v31  ;;  %v2762_v31 = vld [vmem:[#allocation2 + $0x3c] sm:$0xf] }
 0x4bc   :  { %3388 = vmatmul.mubr.msk.bf16.vlgmr.msra.gmra.mrb[60].mxu0 %vm150_vm1, %v2444_v4  ;;  %v2716_v4 = vld [vmem:[#allocation2 + $0x1c] sm:$0xf] }
 0x4bd   :  { %3574 = vmatpush3.bf16.msra.mxu0 %v3769_v32 }
 0x4be   :  { %3575 = vmatprep.subr.bf16.mxu0 %v3770_v36 }
 0x53f   :  { %v3545_v43 = vpop.f32.mrb[44].mxu0 }
 0x540   :  { %v3546_v9 = vpop.f32.mrb[45].mxu0 }
 0x541   :  { %v3547_v54 = vadd.f32 %v3546_v9, %v3545_v43  ;;  %v3548_v11 = vpop.f32.mrb[46].mxu0  ;;  %v3826_v43 = vld [vmem:[#allocation5 + $0x24] ss:$8 sps:$4 sm:$0xff]   ;;  %v3827_v9 = vld [vmem:[#allocation5 + $0x20] ss:$8 sps:$4 sm:$0xff]  }
 0x542   :  { %v3549_v56 = vpop.f32.mrb[47].mxu0 }
 0x543   :  { %v4498_v5 = vadd.f32 %v3547_v54, %v4437_v7  ;;  %v2810_v54 = vld [vmem:[#allocation2 + $0x5c] sm:$0xf] }
 0x553   :  { %v2068_v57 = vpop.f32.mrb[48].mxu0 }
 0x554   :  { %v2075_v59 = vmax.f32 %v4479_v25, %v2068_v57  ;;  %v2070_v8 = vpop.f32.mrb[49].mxu0  ;;  %v2396_v25 = vld [vmem:[#allocation2 + $0x38] sm:$0xf] }
 0x555   :  { %v2076_v60 = vmax.f32 %v4481_v30, %v2070_v8  ;;  %v2072_v61 = vpop.f32.mrb[50].mxu0 }
 0x556   :  { %v2123_v62 = vmax.f32 %v2075_v59, %v2116_v37  ;;  %v2073_v13 = vpop.f32.mrb[51].mxu0  ;;  %v3771_v37 = vld [vmem:[#allocation7 + $0x308] sm:$0xff]  }
 0x557   :  { %v2124_v15 = vmax.f32 %v2076_v60, %v2118_v38  ;;  %3576 = vmatpush3.bf16.msra.mxu0 %v3771_v37  ;;  %v3790_v37 = vld [vmem:[#allocation7 + $0x3d8] sm:$0xff]  }
 0x558   :  { %3577 = vmatprep.subr.bf16.mxu0 %v3772_v40  ;;  %v3792_v40 = vld [vmem:[#allocation7 + $0x3e0] sm:$0xff]  }
 0x55b   :  { %3578 = vmatpush3.bf16.msra.mxu0 %v3773_v41  ;;  %v3793_v41 = vld [vmem:[#allocation7 + $0x3a0] sm:$0xff]  }
 0x55c   :  { %3579 = vmatprep.subr.bf16.mxu0 %v3774_v42  ;;  %v3794_v42 = vld [vmem:[#allocation7 + $0x3e8] sm:$0xff]  }
 0x55f   :  { %3580 = vmatpush3.bf16.msra.mxu0 %v3775_v44  ;;  %v3797_v44 = vld [vmem:[#allocation7 + $0x3b0] sm:$0xff]  }
 0x560   :  { %3581 = vmatprep.subr.bf16.mxu0 %v3776_v45  ;;  %v3798_v45 = vld [vmem:[#allocation7 + $0x3f8] sm:$0xff]  }
 0x563   :  { %3582 = vmatpush3.bf16.msra.mxu0 %v3777_v46  ;;  %v3799_v46 = vld [vmem:[#allocation7 + $0x3b8] sm:$0xff]  }
 0x564   :  { %3583 = vmatprep.subr.bf16.mxu0 %v3778_v47  ;;  %v3800_v47 = vld [vmem:[#allocation8] sm:$0xff]  }
 0x567   :  { %v2164_v1 = vpop.f32.mrb[52].mxu0  ;;  %3584 = vmatpush3.bf16.msra.mxu0 %v3779_v48  ;;  %v3955_v48 = vmov 0.0  }
 0x568   :  { %v2171_v16 = vmax.f32 %v2123_v62, %v2164_v1  ;;  %v2166_v18 = vpop.f32.mrb[53].mxu0  ;;  %3585 = vmatprep.subr.bf16.mxu0 %v3780_v49  ;;  %v3801_v49 = vld [vmem:[#allocation8 + $0x8] sm:$0xff]  }
 0x569   :  { %v2172_v19 = vmax.f32 %v2124_v15, %v2166_v18  ;;  %v2168_v20 = vpop.f32.mrb[54].mxu0 }
 0x56a   :  { %v2173_v22 = vadd.f32 %v2171_v16, %v4192_v17  ;;  %v2169_v23 = vpop.f32.mrb[55].mxu0 }
 0x56b   :  { %v2174_v7 = vadd.f32 %v2172_v19, %v4194_v21  ;;  %3586 = vmatpush3.bf16.msra.mxu0 %v3781_v50  ;;  %v3802_v50 = vld [vmem:[#allocation8 + $0x10] sm:$0xff]  }
 0x56c   :  { %v2175_v24 = vmax.f32 %v2173_v22, 0.0  ;;  %3587 = vmatprep.subr.bf16.mxu0 %v3782_v51  ;;  %v3803_v51 = vld [vmem:[#allocation8 + $0x18] sm:$0xff]  }
 0x56d   :  { %v2176_v27 = vmax.f32 %v2174_v7, 0.0 }
 0x56e   :  { %v2177_v28 = vpack.c.bf16 %v2175_v24, %v2175_v24 }
 0x56f   :  { %v2178_v52 = vpack.c.bf16 %v2176_v27, %v2176_v27  ;;  %3588 = vmatpush3.bf16.msra.mxu0 %v3783_v53  ;;  %v3804_v53 = vld [vmem:[#allocation8 + $0x20] sm:$0xff]  }
 0x570   :  { %2766 = vmatprep.subr.bf16.mxu0 %v4521_v26 }
 0x571   :  { %2340 = vmatprep.mubr.bf16.mxu1 %v2178_v52 }
 0x572   :  { %2341 = vmatmul.mubr.bf16.vlgmr.msra.gmra.mrb[60].mxu1 %v2177_v28 }
 0x573   :  { %2401 = vmatpush1.bf16.msra.mxu1 %v4504_v33  ;;  %2432 = vmatprep.mubr.bf16.mxu1 %v3954_v0 }
 0x574   :  { %2402 = vmatprep.subr.bf16.mxu1 %v4508_v14 }
 0x577   :  { %2403 = vmatpush1.bf16.msra.mxu1 %v4511_v34 }
 0x578   :  { %2404 = vmatprep.subr.bf16.mxu1 %v4245_v63 }
 0x57b   :  { %2405 = vmatpush1.bf16.msra.mxu1 %v4250_v6  ;;  %v4554_v30 = vpop.f32.mrb[56].mxu0 }
 0x57c   :  { %2406 = vmatprep.subr.bf16.mxu1 %v4225_v55  ;;  %v4531_v55 = vld [vmem:[#allocation5 + $0x34] ss:$8 sps:$4 sm:$0xff]   ;;  %v4556_v35 = vpop.f32.mrb[57].mxu0 }
 0x57f   :  { %2407 = vmatpush1.bf16.msra.mxu1 %v4230_v58  ;;  %v4534_v58 = vld [vmem:[#allocation5 + $0x30] ss:$8 sps:$4 sm:$0xff]  }
 0x580   :  { %3385 = vmatprep.subr.msk.bf16.mxu1 %vm154_vm0, %v4097_v12 }
 0x583   :  { %2409 = vmatpush1.bf16.msra.mxu1 %v4089_v10 }
 0x584   :  { %2496 = vmatprep.subr.bf16.mxu1 %v4521_v26 }
 0x586   :  { %3386 = vmatmul.mubr.msk.bf16.vlgmr.msra.gmra.mrb[64].mxu1 %vm150_vm1, %v2396_v25 }
 0x587   :  { %2497 = vmatpush1.bf16.msra.mxu1 %v4504_v33  ;;  %2528 = vmatprep.mubr.bf16.mxu1 %v3954_v0 }
 0x588   :  { %2498 = vmatprep.subr.bf16.mxu1 %v4508_v14 }
 0x58b   :  { %2499 = vmatpush1.bf16.msra.mxu1 %v4511_v34 }
 0x58c   :  { %2500 = vmatprep.subr.bf16.mxu1 %v4245_v63 }
 0x58f   :  { %2501 = vmatpush1.bf16.msra.mxu1 %v4250_v6 }
 0x590   :  { %2502 = vmatprep.subr.bf16.mxu1 %v4531_v55 }
 0x593   :  { %2503 = vmatpush1.bf16.msra.mxu1 %v4534_v58 }
 0x594   :  { %3389 = vmatprep.subr.msk.bf16.mxu1 %vm154_vm0, %v4097_v12 }
 0x597   :  { %2505 = vmatpush1.bf16.msra.mxu1 %v4089_v10 }
 0x598   :  { %2720 = vmatprep.subr.bf16.mxu1 %v4521_v26 }
 0x59a   :  { %3390 = vmatmul.mubr.msk.bf16.vlgmr.msra.gmra.mrb[68].mxu1 %vm150_vm1, %v2492_v29 }
 0x59b   :  { %2721 = vmatpush1.bf16.msra.mxu1 %v4504_v33  ;;  %2752 = vmatprep.mubr.bf16.mxu1 %v3954_v0 }
 0x59c   :  { %2722 = vmatprep.subr.bf16.mxu1 %v4508_v14 }
 0x59f   :  { %2723 = vmatpush1.bf16.msra.mxu1 %v4511_v34 }
 0x5a0   :  { %2724 = vmatprep.subr.bf16.mxu1 %v4245_v63  ;;  %v2392_v63 = vpop.f32.mrb[58].mxu0 }
 0x5a1   :  { %v3787_v63 = vld [vmem:[#allocation7 + $0x388] sm:$0xff]  }
 0x5a3   :  { %2725 = vmatpush1.bf16.msra.mxu1 %v4250_v6  ;;  %v2393_v6 = vpop.f32.mrb[59].mxu0 }
 0x5a4   :  { %2726 = vmatprep.subr.bf16.mxu1 %v4531_v55  ;;  %v2482_v38 = vpop.f32.mrb[60].mxu0 }
 0x5a5   :  { %v2484_v39 = vpop.f32.mrb[61].mxu0 }
 0x5a6   :  { %v2486_v2 = vpop.f32.mrb[62].mxu0 }
 0x5a7   :  { %2727 = vmatpush1.bf16.msra.mxu1 %v4534_v58  ;;  %v2487_v3 = vpop.f32.mrb[63].mxu0  ;;  %v3795_v2 = vld [vmem:[#allocation7 + $0x3a8] sm:$0xff]  }
 0x5a8   :  { %3407 = vmatprep.subr.msk.bf16.mxu1 %vm154_vm0, %v4097_v12  ;;  %v3796_v3 = vld [vmem:[#allocation7 + $0x3f0] sm:$0xff]  }
 0x5ab   :  { %2729 = vmatpush1.bf16.msra.mxu1 %v4089_v10 }
 0x5ac   :  { %2814 = vmatprep.subr.bf16.mxu1 %v4521_v26 }
 0x5ae   :  { %3408 = vmatmul.mubr.msk.bf16.vlgmr.msra.gmra.mrb[72].mxu1 %vm150_vm1, %v2716_v4 }
 0x5af   :  { %2815 = vmatpush1.bf16.msra.mxu1 %v4504_v33  ;;  %2846 = vmatprep.mubr.bf16.mxu1 %v3954_v0 }
 0x5b0   :  { %2816 = vmatprep.subr.bf16.mxu1 %v4508_v14 }
 0x5b3   :  { %2817 = vmatpush1.bf16.msra.mxu1 %v4511_v34 }
 0x5b4   :  { %2818 = vmatprep.subr.bf16.mxu1 %v3826_v43 }
 0x5b7   :  { %2819 = vmatpush1.bf16.msra.mxu1 %v3827_v9 }
 0x5b8   :  { %2820 = vmatprep.subr.bf16.mxu1 %v4531_v55 }
 0x5bb   :  { %2821 = vmatpush1.bf16.msra.mxu1 %v4534_v58 }
 0x5bc   :  { %3411 = vmatprep.subr.msk.bf16.mxu1 %vm154_vm0, %v4097_v12 }
 0x5bf   :  { %2823 = vmatpush1.bf16.msra.mxu1 %v4089_v10 }
 0x5c2   :  { %3412 = vmatmul.mubr.msk.bf16.vlgmr.msra.gmra.mrb[76].mxu1 %vm150_vm1, %v2810_v54 }
 0x645   :  { %v3567_v11 = vpop.f32.mrb[60].mxu1 }
 0x646   :  { %v3568_v56 = vpop.f32.mrb[61].mxu1 }
 0x647   :  { %v3569_v57 = vadd.f32 %v3568_v56, %v3567_v11  ;;  %v3570_v59 = vpop.f32.mrb[62].mxu1 }
 0x648   :  { %v3571_v8 = vpop.f32.mrb[63].mxu1 }
 0x649   :  { %v4571_v60 = vadd.f32 %v3569_v57, %v4498_v5 }
 0x659   :  { %v2434_v61 = vpop.f32.mrb[64].mxu1 }
 0x65a   :  { %v2441_v62 = vmax.f32 %v4554_v30, %v2434_v61  ;;  %v2436_v13 = vpop.f32.mrb[65].mxu1 }
 0x65b   :  { %v2442_v15 = vmax.f32 %v4556_v35, %v2436_v13  ;;  %v2438_v1 = vpop.f32.mrb[66].mxu1  ;;  %v3785_v35 = vld [vmem:[#allocation7 + $0x380] sm:$0xff]  }
 0x65c   :  { %v2489_v16 = vmax.f32 %v2441_v62, %v2482_v38  ;;  %v2439_v18 = vpop.f32.mrb[67].mxu1 }
 0x65d   :  { %v2490_v19 = vmax.f32 %v2442_v15, %v2484_v39  ;;  %v3791_v39 = vld [vmem:[#allocation7 + $0x398] sm:$0xff]  }
 0x66d   :  { %v2530_v20 = vpop.f32.mrb[68].mxu1 }
 0x66e   :  { %v2537_v22 = vmax.f32 %v2489_v16, %v2530_v20  ;;  %v2532_v23 = vpop.f32.mrb[69].mxu1 }
 0x66f   :  { %v2538_v7 = vmax.f32 %v2490_v19, %v2532_v23  ;;  %v2534_v24 = vpop.f32.mrb[70].mxu1 }
 0x670   :  { %v2539_v27 = vadd.f32 %v2537_v22, %v4192_v17  ;;  %v2535_v52 = vpop.f32.mrb[71].mxu1 }
 0x671   :  { %v2540_v5 = vadd.f32 %v2538_v7, %v4194_v21 }
 0x672   :  { %v2541_v28 = vmax.f32 %v2539_v27, 0.0 }
 0x673   :  { %v2542_v25 = vmax.f32 %v2540_v5, 0.0 }
 0x674   :  { %v2543_v30 = vpack.c.bf16 %v2541_v28, %v2541_v28  ;;  %v3805_v28 = vld [vmem:[#allocation8 + $0x28] sm:$0xff]  }
 0x675   :  { %v2544_v29 = vpack.c.bf16 %v2542_v25, %v2542_v25  ;;  %v3806_v25 = vld [vmem:[#allocation8 + $0x30] sm:$0xff]  }
 0x677   :  { %2706 = vmatprep.mubr.bf16.mxu0 %v2544_v29  ;;  %v3807_v29 = vld [vmem:[#allocation8 + $0x38] sm:$0xff]  }
 0x678   :  { %2707 = vmatmul.mubr.bf16.vlgmr.msra.gmra.mrb[64].mxu0 %v2543_v30 }
 0x679   :  { %2767 = vmatpush1.bf16.msra.mxu0 %v4504_v33  ;;  %2798 = vmatprep.mubr.bf16.mxu0 %v3954_v0 }
 0x67a   :  { %2768 = vmatprep.subr.bf16.mxu0 %v4508_v14 }
 0x67d   :  { %2769 = vmatpush1.bf16.msra.mxu0 %v4511_v34 }
 0x67e   :  { %2770 = vmatprep.subr.bf16.mxu0 %v3826_v43 }
 0x681   :  { %2771 = vmatpush1.bf16.msra.mxu0 %v3827_v9 }
 0x682   :  { %2772 = vmatprep.subr.bf16.mxu0 %v4531_v55 }
 0x685   :  { %2773 = vmatpush1.bf16.msra.mxu0 %v4534_v58 }
 0x686   :  { %3409 = vmatprep.subr.msk.bf16.mxu0 %vm154_vm0, %v4097_v12 }
 0x689   :  { %2775 = vmatpush1.bf16.msra.mxu0 %v4089_v10 }
 0x68a   :  { %2862 = vmatprep.subr.bf16.mxu0 %v4521_v26  ;;  %v2858_v26 = vld [vmem:[#allocation2 + $0x7c] sm:$0xf] }
 0x68c   :  { %3410 = vmatmul.mubr.msk.bf16.vlgmr.msra.gmra.mrb[68].mxu0 %vm150_vm1, %v2762_v31 }
 0x68d   :  { %2863 = vmatpush1.bf16.msra.mxu0 %v4504_v33  ;;  %2894 = vmatprep.mubr.bf16.mxu0 %v3954_v0  ;;  %v4598_v33 = vpop.f32.mrb[72].mxu1  ;;  %v3784_v0 = vld [vmem:[#allocation7 + $0x3c0] sm:$0xff]  }
 0x68e   :  { %2864 = vmatprep.subr.bf16.mxu0 %v4508_v14  ;;  %v4600_v14 = vpop.f32.mrb[73].mxu1  ;;  %3595 = vmatprep.subr.bf16.mxu1 %v3784_v0 }
 0x68f   :  { %3596 = vmatpush3.bf16.msra.mxu1 %v3785_v35  ;;  %v3432_v35 = vld [vmem:[%s4631_s6] ss:$0 sm:$0xff] }
 0x691   :  { %2865 = vmatpush1.bf16.msra.mxu0 %v4511_v34  ;;  %v2758_v34 = vpop.f32.mrb[74].mxu1 }
 0x692   :  { %2866 = vmatprep.subr.bf16.mxu0 %v3826_v43  ;;  %v2759_v32 = vpop.f32.mrb[75].mxu1 }
 0x695   :  { %2867 = vmatpush1.bf16.msra.mxu0 %v3827_v9 }
 0x696   :  { %2868 = vmatprep.subr.bf16.mxu0 %v4531_v55  ;;  %v3786_v55 = vld [vmem:[#allocation7 + $0x3c8] sm:$0xff]  }
 0x697   :  { %3597 = vmatprep.subr.bf16.mxu1 %v3786_v55 }
 0x698   :  { %3598 = vmatpush3.bf16.msra.mxu1 %v3787_v63 }
 0x699   :  { %2869 = vmatpush1.bf16.msra.mxu0 %v4534_v58  ;;  %v2848_v58 = vpop.f32.mrb[76].mxu1 }
 0x69a   :  { %3413 = vmatprep.subr.msk.bf16.mxu0 %vm154_vm0, %v4097_v12  ;;  %v2850_v6 = vpop.f32.mrb[77].mxu1  ;;  %v3789_v12 = vld [vmem:[#allocation7 + $0x390] sm:$0xff]  }
 0x69b   :  { %v2852_v36 = vpop.f32.mrb[78].mxu1 }
 0x69c   :  { %v2853_v38 = vpop.f32.mrb[79].mxu1 }
 0x69d   :  { %2871 = vmatpush1.bf16.msra.mxu0 %v4089_v10  ;;  %v3788_v10 = vld [vmem:[#allocation7 + $0x3d0] sm:$0xff]  }
 0x69e   :  { %3599 = vmatprep.subr.bf16.mxu1 %v3788_v10  ;;  %3626 = vmatprep.subr.bf16.mxu0 %v3955_v48 }
 0x69f   :  { %3600 = vmatpush3.bf16.msra.mxu1 %v3789_v12 }
 0x6a0   :  { %3414 = vmatmul.mubr.msk.bf16.vlgmr.msra.gmra.mrb[72].mxu0 %vm150_vm1, %v2858_v26  ;;  %3601 = vmatprep.subr.bf16.mxu1 %v3790_v37  ;;  %v3431_v26 = vld [vmem:[%s4629_s4] ss:$0 sm:$0xff]  ;;  %s3957_s4 = smov [#allocation10]  }
 0x6a1   :  { %3627 = vmatpush3.bf16.msra.mxu0 %v3800_v47  ;;  %3642 = vmatprep.mubr.msk.bf16.mxu0 %vm3956_vm2, %v3955_v48  ;;  %s3218_s30 = sshll.u32 %s3957_s4, 4  ;;  %s3219_s30 = int_to_ptr.vmem [resolvable:$true] %s3218_s30 }
 0x6a2   :  { %3628 = vmatprep.subr.bf16.mxu0 %v3955_v48  ;;  %s3916_s6 = scalar_lea.vmem %s3219_s30, 128  ;;  %p3921_p5 = scmp.lt.s32.totalorder %s3219_s30, %s3219_s30 }
 0x6a3   :  { %3602 = vmatpush3.bf16.msra.mxu1 %v3791_v39  ;;  %p3917_p4 = scmp.ne.s32.totalorder %s3219_s30, %s3916_s6  ;;  %p3922_p6 = scmp.lt.s32.totalorder %s3916_s6, %s3916_s6 }
 0x6a4   :  { %3603 = vmatprep.subr.bf16.mxu1 %v3792_v40 }
 0x6a5   :  { %3629 = vmatpush3.bf16.msra.mxu0 %v3801_v49  ;;  %p3923_p7 = por %p3922_p6, %p3921_p5 }
 0x6a6   :  { %3630 = vmatprep.subr.bf16.mxu0 %v3955_v48 }
 0x6a7   :  { %3604 = vmatpush3.bf16.msra.mxu1 %v3793_v41  ;;  %p3924_p8 = pnand %p3923_p7, %p3917_p4 }
 0x6a8   :  { %3605 = vmatprep.subr.bf16.mxu1 %v3794_v42 }
 0x6a9   :  { %3631 = vmatpush3.bf16.msra.mxu0 %v3802_v50 }
 0x6aa   :  { %3632 = vmatprep.subr.bf16.mxu0 %v3955_v48 }
 0x6ab   :  { %3606 = vmatpush3.bf16.msra.mxu1 %v3795_v2 }
 0x6ac   :  { %3607 = vmatprep.subr.bf16.mxu1 %v3796_v3 }
 0x6ad   :  { %3633 = vmatpush3.bf16.msra.mxu0 %v3803_v51 }
 0x6ae   :  { %3634 = vmatprep.subr.bf16.mxu0 %v3955_v48 }
 0x6af   :  { %3608 = vmatpush3.bf16.msra.mxu1 %v3797_v44 }
 0x6b0   :  { %3609 = vmatprep.subr.bf16.mxu1 %v3798_v45 }
 0x6b1   :  { %3635 = vmatpush3.bf16.msra.mxu0 %v3804_v53 }
 0x6b2   :  { %3636 = vmatprep.subr.bf16.mxu0 %v3955_v48 }
 0x6b3   :  { %3610 = vmatpush3.bf16.msra.mxu1 %v3799_v46 }
 0x6b5   :  { %3637 = vmatpush3.bf16.msra.mxu0 %v3805_v28 }
 0x6b6   :  { %3638 = vmatprep.subr.bf16.mxu0 %v3955_v48 }
 0x6b9   :  { %3639 = vmatpush3.bf16.msra.mxu0 %v3806_v25 }
 0x6ba   :  { %3640 = vmatprep.subr.bf16.mxu0 %v3955_v48 }
 0x6bd   :  { %3641 = vmatpush3.bf16.msra.mxu0 %v3807_v29 }
 0x74b   :  { %v3589_v4 = vpop.f32.mrb[64].mxu0 }
 0x74c   :  { %v3590_v43 = vpop.f32.mrb[65].mxu0 }
 0x74d   :  { %v3591_v9 = vadd.f32 %v3590_v43, %v3589_v4  ;;  %v3592_v54 = vpop.f32.mrb[66].mxu0 }
 0x74e   :  { %v3593_v11 = vpop.f32.mrb[67].mxu0 }
 0x74f   :  { %v2714_v56 = vadd.f32 %v3591_v9, %v4571_v60 }
 0x75f   :  { %v2800_v57 = vpop.f32.mrb[68].mxu0 }
 0x760   :  { %v2807_v59 = vmax.f32 %v4598_v33, %v2800_v57  ;;  %v2802_v8 = vpop.f32.mrb[69].mxu0 }
 0x761   :  { %v2808_v61 = vmax.f32 %v4600_v14, %v2802_v8  ;;  %v2804_v62 = vpop.f32.mrb[70].mxu0 }
 0x762   :  { %v2855_v13 = vmax.f32 %v2807_v59, %v2848_v58  ;;  %v2805_v15 = vpop.f32.mrb[71].mxu0 }
 0x763   :  { %v2856_v1 = vmax.f32 %v2808_v61, %v2850_v6 }
 0x773   :  { %v2896_v16 = vpop.f32.mrb[72].mxu0 }
 0x774   :  { %v2903_v18 = vmax.f32 %v2855_v13, %v2896_v16  ;;  %v2898_v19 = vpop.f32.mrb[73].mxu0 }
 0x775   :  { %v2904_v20 = vmax.f32 %v2856_v1, %v2898_v19  ;;  %v2900_v22 = vpop.f32.mrb[74].mxu0 }
 0x776   :  { %v2905_v23 = vadd.f32 %v2903_v18, %v4192_v17  ;;  %v2901_v7 = vpop.f32.mrb[75].mxu0 }
 0x777   :  { %v2906_v60 = vadd.f32 %v2904_v20, %v4194_v21 }
 0x778   :  { %v2907_v24 = vmax.f32 %v2905_v23, 0.0 }
 0x779   :  { %v2908_v27 = vmax.f32 %v2906_v60, 0.0 }
 0x77a   :  { %v2909_v5 = vpack.c.bf16 %v2907_v24, %v2907_v24 }
 0x77b   :  { %v2910_v52 = vpack.c.bf16 %v2908_v27, %v2908_v27 }
 0x77d   :  { %3072 = vmatprep.mubr.bf16.mxu1 %v2910_v52 }
 0x77e   :  { %3073 = vmatmul.mubr.bf16.vlgmr.msra.gmra.mrb[80].mxu1 %v2909_v5 }
 0x851   :  { %v3611_v17 = vpop.f32.mrb[80].mxu1 }
 0x852   :  { %v3612_v30 = vpop.f32.mrb[81].mxu1 }
 0x853   :  { %v3613_v31 = vadd.f32 %v3612_v30, %v3611_v17  ;;  %v3614_v21 = vpop.f32.mrb[82].mxu1 }
 0x854   :  { %v3615_v33 = vpop.f32.mrb[83].mxu1 }
 0x855   :  { %v3080_v0 = vadd.f32 %v3613_v31, %v2714_v56 }
 0x857   :  { %v3088_v14 = vadd.f32 %v3431_v26, %v3080_v0 }
 0x859   :  { %v3089_v34 = vmax.f32 %v3088_v14, 0.0 }
 0x85b   :  { %v3090_v32 = vpack.c.bf16 %v3089_v34, %v3089_v34 }
 0x85d   :  { %3643 = vmatmul.mubr.bf16.vlgmr.msra.gmra.mrb[76].mxu0 %v3090_v32 }
 0x930   :  { %v3196_v55 = vpop.f32.mrb[76].mxu0 }
 0x931   :  { %v3197_v58 = vadd.f32 %v3432_v35, %v3196_v55  ;;  %v3644_v63 = vpop.f32.mrb[77].mxu0 }
 0x932   :  { %v3199_v6 = vpop.f32.mrb[78].mxu0 }
 0x933   :  { %3202 = vmax.xlane.f32.xlu0 %v3197_v58  ;;  %v3645_v10 = vpop.f32.mrb[79].mxu0 }
 0x9c0   :  { %v3203_v12 = vpop.xlane.xlu0 %3202 }
 0x9c1   :  { %v3204_v36 = vsub.f32 %v3197_v58, %v3203_v12 }
 0x9c3   :  { %v3205_v37 = vmul.f32 1.442695, %v3204_v36 }
 0x9c5   :  { %3808 = vpow2.f32 %v3205_v37 }
 0x9cf   :  { %v3809_v38 = vpop.eup %3808 }
 0x9d0   :  { %3207 = vadd.xlane.f32.xlu0 %v3809_v38 }
 0xa5d   :  { %v3208_v39 = vpop.xlane.xlu0 %3207 }
 0xa5e   :  { %3810 = vrcp.f32 %v3208_v39 }
 0xa68   :  { %v3811_v40 = vpop.eup %3810 }
 0xa69   :  { %v3210_v41 = vmul.f32 %v3811_v40, %v3809_v38 }
 0xa6b   :  { %3211 = vst [vmem:[#allocation10] sm:$0xff] %v3210_v41 }
 0xa6c   :  { %3927 = shalt.err (!%p3924_p8)
}
 0xa6d   :  { %s3928_s10 = scalar_lea.hbm %s4632_s7, 128 }
 0xa6e   :  { %p3929_p9 = scmp.ne.s32.totalorder %s4632_s7, %s3928_s10  ;;  %p3932_p10 = scmp.lt.u32.totalorder %s3928_s10, %s4632_s7 }
 0xa70   :  { %p3934_p11 = pnand %p3932_p10, %p3929_p9 }
 0xa72   :  { %3937 = shalt.err (!%p3934_p11)
}
 0xa73   :  { %3221 = dma.vmem_to_hbm [thread:$0]  %s3219_s30, 128, %s4632_s7, [#allocation4]  }
 0xa74   :  { %3944 = dma.done.wait [#allocation4], 128  }
 0xa75   :  { %3945 = vsyncadd [#allocation4], 4294967168 }
 0xa76   :  { %3225 = vsyncpa [#allocation3], 1 }
 0xa77   :  { %3226 = vsyncpa [#allocation6], 1 }
 0xa78   :  { %3227 = vsyncpa [#allocation9], 1 }
 0xa79   :  { %3228 = vsyncpa [#allocation4], 1 }

</bundles_post_ra>
